<compile_context>
chip_gen: v7x
topology: tpu7x:2x2x1
jax: 0.10.0
libtpu: 0.0.40
codegen_flags: <defaults>
</compile_context>

<pallas_src>
import functools

import jax
import jax.numpy as jnp
from jax.experimental import pallas as pl
from jax.experimental.pallas import tpu as pltpu

BN_EPS = 1e-5
LANE = 128


def _round_up(x, m):
    return ((x + m - 1) // m) * m


def _pad2(x, rows, cols, dtype=jnp.float32):
    out = jnp.zeros((rows, cols), dtype)
    return out.at[: x.shape[0], : x.shape[1]].set(x.astype(dtype))


# ----------------------- fused GatedGCN stack + head ----------------------- #
def _fused_ggcn_kernel(h0_ref, e0_ref, src_oh_ref, dst_oh_ref, dst_oh_t_ref,
                       w_nodes_ref, b_nodes_ref, w_c_ref, b_c_ref,
                       bnh_scale_ref, bnh_shift_ref,
                       bne_scale_ref, bne_shift_ref,
                       w1_ref, b1_ref, w2_ref, b2_ref, w3_ref, b3_ref,
                       hg_ref,
                       h_scr, e_scr, msg_scr,
                       *, hidden_p, n_layers, batch_norm, residual,
                       pooling, n_nodes):
    Hp = hidden_p
    layer = pl.program_id(0)

    # Layer 0: bring initial node / edge features into the VMEM carry.
    @pl.when(layer == 0)
    def _():
        h_scr[...] = h0_ref[...]
        e_scr[...] = e0_ref[...]

    h = h_scr[...]                                   # (N, Hp) f32
    e = e_scr[...]                                   # (E, Hp) f32

    # Fused node linears; 128-aligned column slabs [A | B | D | E] so every
    # slice below is a zero-cost view.  bf16 x bf16 matmul, f32 accumulation.
    hw = jnp.dot(h.astype(jnp.bfloat16), w_nodes_ref[...],
                 preferred_element_type=jnp.float32) + b_nodes_ref[...]   # (N, 4Hp)
    Ah = hw[:, :Hp]
    BDh = hw[:, Hp:3 * Hp]                           # [Bh | Dh]
    Eh = hw[:, 3 * Hp:]

    # Edge linear C.
    Ce = jnp.dot(e.astype(jnp.bfloat16), w_c_ref[...],
                 preferred_element_type=jnp.float32) + b_c_ref[...]       # (E, Hp)

    # Per-edge source / destination gathers as bf16 incidence matmuls
    # (one-hot {0,1} is exact in bf16).
    bd_src = jnp.dot(src_oh_ref[...], BDh.astype(jnp.bfloat16),
                     preferred_element_type=jnp.float32)                  # (E, 2Hp)
    Bh_src = bd_src[:, :Hp]
    Dh_src = bd_src[:, Hp:]
    Eh_dst = jnp.dot(dst_oh_ref[...], Eh.astype(jnp.bfloat16),
                     preferred_element_type=jnp.float32)                  # (E, Hp)

    # apply_edges(u_add_v(Dh, Eh)); e = DEh + Ce; sigma = sigmoid(e)
    e_new = Dh_src + Eh_dst + Ce
    sigma = jax.nn.sigmoid(e_new)

    # Message tensor assembled in a preallocated VMEM scratch at 128-aligned
    # offsets (no lane-axis concatenate / extra copy).
    msg_scr[:, :Hp] = (sigma * Bh_src).astype(jnp.bfloat16)
    msg_scr[:, Hp:] = sigma.astype(jnp.bfloat16)

    # Both destination sums in one matmul against the precomputed transposed
    # incidence (no per-layer XLU transpose).
    agg = jnp.dot(dst_oh_t_ref[...], msg_scr[...],
                  preferred_element_type=jnp.float32)                     # (N, 2Hp)
    sum_sigma_h = agg[:, :Hp]
    sum_sigma = agg[:, Hp:]

    # Degree normalisation: EUP approx reciprocal + one Newton step.
    denom = sum_sigma + 1e-6
    inv = pl.reciprocal(denom, approx=True)
    inv = inv * (2.0 - denom * inv)
    h_new = Ah + sum_sigma_h * inv

    if batch_norm:  # eval-mode BN folded into per-channel scale/shift on host
        h_new = h_new * bnh_scale_ref[...] + bnh_shift_ref[...]
        e_new = e_new * bne_scale_ref[...] + bne_shift_ref[...]

    h_act = jnp.maximum(h_new, 0.0)
    e_act = jnp.maximum(e_new, 0.0)
    if residual:
        h_act = h + h_act
        e_act = e + e_act

    # TODO(synk): dropout is identity in eval mode; training-mode dropout not implemented.
    h_scr[...] = h_act
    e_scr[...] = e_act

    # Last layer: readout pooling + 3-layer MLP head, straight to the output
    # (lane-dense padded output; real columns sliced in the wrapper).
    @pl.when(layer == n_layers - 1)
    def _():
        if pooling == "sum":
            hg = jnp.sum(h_act, axis=0, keepdims=True)
        elif pooling == "mean":
            hg = jnp.sum(h_act, axis=0, keepdims=True) * (1.0 / float(n_nodes))
        else:  # "max"
            hg = jnp.max(h_act, axis=0, keepdims=True)
        y = jnp.dot(hg.astype(jnp.bfloat16), w1_ref[...],
                    preferred_element_type=jnp.float32) + b1_ref[...]
        y = jnp.maximum(y, 0.0)
        y = jnp.dot(y.astype(jnp.bfloat16), w2_ref[...],
                    preferred_element_type=jnp.float32) + b2_ref[...]
        y = jnp.maximum(y, 0.0)
        y = jnp.dot(y.astype(jnp.bfloat16), w3_ref[...],
                    preferred_element_type=jnp.float32) + b3_ref[...]
        hg_ref[...] = y.astype(hg_ref.dtype)


# ------------------------- host-side param packing ------------------------- #
def _fold_bn(gamma, beta, mean, var, H, Hp):
    scale = gamma * jax.lax.rsqrt(var + BN_EPS)
    shift = beta - mean * scale
    # Padded channels: scale=1, shift=0 so padded lanes stay exactly zero.
    scale_p = jnp.ones((1, Hp), jnp.float32).at[0, :H].set(scale)
    shift_p = jnp.zeros((1, Hp), jnp.float32).at[0, :H].set(shift)
    return scale_p, shift_p


def _prepare_layer_params(layers, H, Hp):
    w_nodes, b_nodes, w_c, b_c = [], [], [], []
    bnh_s, bnh_f, bne_s, bne_f = [], [], [], []
    for p in layers:
        w = jnp.zeros((Hp, 4 * Hp), jnp.float32)
        b = jnp.zeros((1, 4 * Hp), jnp.float32)
        for slab, name in enumerate(("A", "B", "D", "E")):
            w = w.at[:H, slab * Hp:slab * Hp + H].set(p["w" + name])
            b = b.at[0, slab * Hp:slab * Hp + H].set(p["b" + name])
        w_nodes.append(w.astype(jnp.bfloat16))
        b_nodes.append(b)
        w_c.append(_pad2(p["wC"], Hp, Hp, jnp.bfloat16))
        b_c.append(_pad2(p["bC"][None, :], 1, Hp))
        s, f = _fold_bn(p["bnh_gamma"], p["bnh_beta"], p["bnh_mean"], p["bnh_var"], H, Hp)
        bnh_s.append(s); bnh_f.append(f)
        s, f = _fold_bn(p["bne_gamma"], p["bne_beta"], p["bne_mean"], p["bne_var"], H, Hp)
        bne_s.append(s); bne_f.append(f)
    stk = jnp.stack
    return dict(w_nodes=stk(w_nodes), b_nodes=stk(b_nodes),
                w_c=stk(w_c), b_c=stk(b_c),
                bnh_scale=stk(bnh_s), bnh_shift=stk(bnh_f),
                bne_scale=stk(bne_s), bne_shift=stk(bne_f))


def _prepare_mlp_params(mlp, Hp, OutP):
    return dict(
        w1=_pad2(mlp["w1"], Hp, Hp, jnp.bfloat16), b1=_pad2(mlp["b1"][None, :], 1, Hp),
        w2=_pad2(mlp["w2"], Hp, Hp, jnp.bfloat16), b2=_pad2(mlp["b2"][None, :], 1, Hp),
        w3=_pad2(mlp["w3"], Hp, OutP, jnp.bfloat16), b3=_pad2(mlp["b3"][None, :], 1, OutP))


# --------------------------------- wrapper --------------------------------- #
def ggcn_encoder_block(h, e, src, dst, layer_params_list, mlp_params, *,
                       batch_norm, residual, pooling, out_dim):
    N, H = h.shape
    E = src.shape[0]
    L = len(layer_params_list)
    Hp = _round_up(H, LANE)
    OutP = _round_up(out_dim, LANE)

    # Pad features to 128 lanes (padded channels stay exactly zero in-kernel).
    h_pad = _pad2(h, N, Hp)
    e_pad = _pad2(e, E, Hp)

    # Incidence one-hots in bf16 ({0,1} exact); transposed copy precomputed so
    # the destination aggregation is a plain matmul (no per-layer transpose).
    src_oh = jax.nn.one_hot(src, N, dtype=jnp.bfloat16)      # (E, N)
    dst_oh = jax.nn.one_hot(dst, N, dtype=jnp.bfloat16)      # (E, N)
    dst_oh_t = dst_oh.T                                       # (N, E)

    lp = _prepare_layer_params(layer_params_list, H, Hp)
    mp = _prepare_mlp_params(mlp_params, Hp, OutP)

    kernel = functools.partial(
        _fused_ggcn_kernel, hidden_p=Hp, n_layers=L, batch_norm=batch_norm,
        residual=residual, pooling=pooling, n_nodes=N)

    def const(shape):           # same block for every layer step (loaded once)
        return pl.BlockSpec(shape, lambda l: (0,) * len(shape))

    def per_layer(shape):       # leading L axis squeezed, indexed by layer coord
        return pl.BlockSpec((None,) + shape, lambda l: (l,) + (0,) * len(shape))

    grid_spec = pltpu.PrefetchScalarGridSpec(
        num_scalar_prefetch=0,
        grid=(L,),
        in_specs=[
            const((N, Hp)),                # h0
            const((E, Hp)),                # e0
            const((E, N)),                 # src_oh  (bf16)
            const((E, N)),                 # dst_oh  (bf16)
            const((N, E)),                 # dst_oh_t (bf16)
            per_layer((Hp, 4 * Hp)),       # w_nodes [A|B|D|E]   (L, Hp, 4Hp) bf16
            per_layer((1, 4 * Hp)),        # b_nodes             (L, 1, 4Hp)
            per_layer((Hp, Hp)),           # w_c                 (L, Hp, Hp) bf16
            per_layer((1, Hp)),            # b_c
            per_layer((1, Hp)),            # bn_h scale
            per_layer((1, Hp)),            # bn_h shift
            per_layer((1, Hp)),            # bn_e scale
            per_layer((1, Hp)),            # bn_e shift
            const((Hp, Hp)), const((1, Hp)),        # MLP layer 1
            const((Hp, Hp)), const((1, Hp)),        # MLP layer 2
            const((Hp, OutP)), const((1, OutP)),    # MLP layer 3
        ],
        out_specs=pl.BlockSpec((1, OutP), lambda l: (0, 0)),
        scratch_shapes=[pltpu.VMEM((N, Hp), jnp.float32),        # h carry
                        pltpu.VMEM((E, Hp), jnp.float32),        # e carry
                        pltpu.VMEM((E, 2 * Hp), jnp.bfloat16)],  # msg buffer
    )

    # Generation-aware VMEM budget (64 MiB on v7x vs 128 MiB on v5e/v6e).
    try:
        vmem_cap = getattr(pltpu.get_tpu_info(), "vmem_capacity_bytes",
                           64 * 1024 * 1024)
    except Exception:
        vmem_cap = 64 * 1024 * 1024
    vmem_limit = int(min(vmem_cap * 3 // 4, 100 * 1024 * 1024))

    # Rough cost hint for the XLA scheduler.
    flops = (L * 2 * (N * Hp * 4 * Hp + E * Hp * Hp + E * N * 2 * Hp
                      + E * N * Hp + N * E * 2 * Hp)
             + 2 * (Hp * Hp + Hp * Hp + Hp * OutP))
    transcendentals = L * (E * Hp + N * Hp)
    bytes_accessed = (4 * (N * Hp + E * Hp) + 2 * (2 * E * N + N * E)
                      + L * (2 * (Hp * 4 * Hp + Hp * Hp) + 4 * (4 * Hp + 5 * Hp))
                      + 2 * (Hp * Hp * 2 + Hp * OutP)
                      + 4 * (2 * Hp + OutP) + 4 * OutP)

    out = pl.pallas_call(
        kernel,
        out_shape=jax.ShapeDtypeStruct((1, OutP), jnp.float32),
        grid_spec=grid_spec,
        compiler_params=pltpu.CompilerParams(
            dimension_semantics=("arbitrary",),      # layer axis is sequential
            vmem_limit_bytes=vmem_limit),
        cost_estimate=pl.CostEstimate(flops=flops,
                                      transcendentals=transcendentals,
                                      bytes_accessed=bytes_accessed),
    )(h_pad, e_pad, src_oh, dst_oh, dst_oh_t,
      lp["w_nodes"], lp["b_nodes"], lp["w_c"], lp["b_c"],
      lp["bnh_scale"], lp["bnh_shift"], lp["bne_scale"], lp["bne_shift"],
      mp["w1"], mp["b1"], mp["w2"], mp["b2"], mp["w3"], mp["b3"])

    return out[:, :out_dim]


# --------------------------- deterministic params --------------------------- #
def make_layer_params(key, hidden):
    ks = jax.random.split(key, 10)
    s = 1.0 / jnp.sqrt(hidden)
    names = ("A", "B", "C", "D", "E")
    p = {}
    for i, n in enumerate(names):
        p["w" + n] = jax.random.uniform(ks[2 * i], (hidden, hidden), jnp.float32, -s, s)
        p["b" + n] = jax.random.uniform(ks[2 * i + 1], (hidden,), jnp.float32, -s, s)
    # Eval-mode BatchNorm1d (PyTorch defaults: gamma=1, beta=0, mean=0, var=1).
    for tag in ("bnh", "bne"):
        p[tag + "_gamma"] = jnp.ones((hidden,), jnp.float32)
        p[tag + "_beta"] = jnp.zeros((hidden,), jnp.float32)
        p[tag + "_mean"] = jnp.zeros((hidden,), jnp.float32)
        p[tag + "_var"] = jnp.ones((hidden,), jnp.float32)
    return p


def make_mlp_params(key, hidden, out_dim):
    h2, h4 = hidden // 2, hidden // 4
    ks = jax.random.split(key, 6)

    def lin(kw, kb, fin, fout):
        s = 1.0 / jnp.sqrt(fin)
        return (jax.random.uniform(kw, (fin, fout), jnp.float32, -s, s),
                jax.random.uniform(kb, (fout,), jnp.float32, -s, s))

    w1, b1 = lin(ks[0], ks[1], hidden, h2)
    w2, b2 = lin(ks[2], ks[3], h2, h4)
    w3, b3 = lin(ks[4], ks[5], h4, out_dim)
    return dict(w1=w1, b1=b1, w2=w2, b2=b2, w3=w3, b3=b3)


if __name__ == "__main__":
    N_NODES, N_EDGES = 16, 48
    HIDDEN, OUT_DIM, N_LAYERS = 32, 8, 2
    BATCH_NORM, RESIDUAL, POOLING = True, True, "mean"

    key = jax.random.PRNGKey(0)
    k_src, k_dst, k_h, k_e, k_layers, k_mlp = jax.random.split(key, 6)

    # Random graph (single graph in the batch).
    src = jax.random.randint(k_src, (N_EDGES,), 0, N_NODES)
    dst = jax.random.randint(k_dst, (N_EDGES,), 0, N_NODES)

    h = jax.random.normal(k_h, (N_NODES, HIDDEN), jnp.float32)
    e = jax.random.normal(k_e, (N_EDGES, HIDDEN), jnp.float32)

    layer_params_list = [make_layer_params(k, HIDDEN)
                         for k in jax.random.split(k_layers, N_LAYERS)]
    mlp_params = make_mlp_params(k_mlp, HIDDEN, OUT_DIM)

    hg = ggcn_encoder_block(h, e, src, dst, layer_params_list, mlp_params,
                            batch_norm=BATCH_NORM, residual=RESIDUAL,
                            pooling=POOLING, out_dim=OUT_DIM)
    jax.block_until_ready(hg)
    assert hg.shape == (1, OUT_DIM)
    print("KERNEL_OK")
</pallas_src>

<mosaic_0001>
module attributes {stable_mosaic.version = 11 : i64} {
  func.func @_fused_ggcn_kernel(%arg0: i32, %arg1: memref<16x128xf32, #tpu.memory_space<vmem>>, %arg2: memref<48x128xf32, #tpu.memory_space<vmem>>, %arg3: memref<48x16xbf16, #tpu.memory_space<vmem>>, %arg4: memref<48x16xbf16, #tpu.memory_space<vmem>>, %arg5: memref<16x48xbf16, #tpu.memory_space<vmem>>, %arg6: memref<1x128x512xbf16, #tpu.memory_space<vmem>>, %arg7: memref<1x1x512xf32, #tpu.memory_space<vmem>>, %arg8: memref<1x128x128xbf16, #tpu.memory_space<vmem>>, %arg9: memref<1x1x128xf32, #tpu.memory_space<vmem>>, %arg10: memref<1x1x128xf32, #tpu.memory_space<vmem>>, %arg11: memref<1x1x128xf32, #tpu.memory_space<vmem>>, %arg12: memref<1x1x128xf32, #tpu.memory_space<vmem>>, %arg13: memref<1x1x128xf32, #tpu.memory_space<vmem>>, %arg14: memref<128x128xbf16, #tpu.memory_space<vmem>>, %arg15: memref<1x128xf32, #tpu.memory_space<vmem>>, %arg16: memref<128x128xbf16, #tpu.memory_space<vmem>>, %arg17: memref<1x128xf32, #tpu.memory_space<vmem>>, %arg18: memref<128x128xbf16, #tpu.memory_space<vmem>>, %arg19: memref<1x128xf32, #tpu.memory_space<vmem>>, %arg20: memref<1x128xf32, #tpu.memory_space<vmem>>, %arg21: memref<16x128xf32, #tpu.memory_space<vmem>>, %arg22: memref<48x128xf32, #tpu.memory_space<vmem>>, %arg23: memref<48x256xbf16, #tpu.memory_space<vmem>>) attributes {dimension_semantics = [#tpu.dimension_semantics<arbitrary>], iteration_bounds = array<i64: 2>, scalar_prefetch = 0 : i64, scratch_operands = 3 : i64, tpu.core_type = #tpu.core_type<tc>, window_params = [{pipeline_mode = #tpu.pipeline_mode<synchronous>, transform_indices = @transform_0, window_bounds = array<i64: 16, 128>}, {pipeline_mode = #tpu.pipeline_mode<synchronous>, transform_indices = @transform_1, window_bounds = array<i64: 48, 128>}, {pipeline_mode = #tpu.pipeline_mode<synchronous>, transform_indices = @transform_2, window_bounds = array<i64: 48, 16>}, {pipeline_mode = #tpu.pipeline_mode<synchronous>, transform_indices = @transform_3, window_bounds = array<i64: 48, 16>}, {pipeline_mode = #tpu.pipeline_mode<synchronous>, transform_indices = @transform_4, window_bounds = array<i64: 16, 48>}, {transform_indices = @transform_5, window_bounds = array<i64: 1, 128, 512>}, {transform_indices = @transform_6, window_bounds = array<i64: 1, 1, 512>}, {transform_indices = @transform_7, window_bounds = array<i64: 1, 128, 128>}, {transform_indices = @transform_8, window_bounds = array<i64: 1, 1, 128>}, {transform_indices = @transform_9, window_bounds = array<i64: 1, 1, 128>}, {transform_indices = @transform_10, window_bounds = array<i64: 1, 1, 128>}, {transform_indices = @transform_11, window_bounds = array<i64: 1, 1, 128>}, {transform_indices = @transform_12, window_bounds = array<i64: 1, 1, 128>}, {pipeline_mode = #tpu.pipeline_mode<synchronous>, transform_indices = @transform_13, window_bounds = array<i64: 128, 128>}, {pipeline_mode = #tpu.pipeline_mode<synchronous>, transform_indices = @transform_14, window_bounds = array<i64: 1, 128>}, {pipeline_mode = #tpu.pipeline_mode<synchronous>, transform_indices = @transform_15, window_bounds = array<i64: 128, 128>}, {pipeline_mode = #tpu.pipeline_mode<synchronous>, transform_indices = @transform_16, window_bounds = array<i64: 1, 128>}, {pipeline_mode = #tpu.pipeline_mode<synchronous>, transform_indices = @transform_17, window_bounds = array<i64: 128, 128>}, {pipeline_mode = #tpu.pipeline_mode<synchronous>, transform_indices = @transform_18, window_bounds = array<i64: 1, 128>}, {pipeline_mode = #tpu.pipeline_mode<synchronous>, transform_indices = @transform_19, window_bounds = array<i64: 1, 128>}]} {
    %c0_i32 = arith.constant 0 : i32
    %0 = arith.cmpi eq, %arg0, %c0_i32 : i32
    %1 = arith.extui %0 : i1 to i32
    %c0_i32_0 = arith.constant 0 : i32
    %2 = arith.cmpi ne, %1, %c0_i32_0 : i32
    scf.if %2 {
      %c0_53 = arith.constant 0 : index
      %c0_54 = arith.constant 0 : index
      %85 = vector.load %arg1[%c0_53, %c0_54] : memref<16x128xf32, #tpu.memory_space<vmem>>, vector<16x128xf32>
      %c0_55 = arith.constant 0 : index
      %c0_56 = arith.constant 0 : index
      %86 = vector.load %arg21[%c0_55, %c0_56] : memref<16x128xf32, #tpu.memory_space<vmem>>, vector<16x128xf32>
      tpu.vector_store %arg21[%c0_55, %c0_56], %85 {strides = array<i32>} : memref<16x128xf32, #tpu.memory_space<vmem>>, vector<16x128xf32>,
      %c0_57 = arith.constant 0 : index
      %c0_58 = arith.constant 0 : index
      %87 = vector.load %arg2[%c0_57, %c0_58] : memref<48x128xf32, #tpu.memory_space<vmem>>, vector<48x128xf32>
      %c0_59 = arith.constant 0 : index
      %c0_60 = arith.constant 0 : index
      %88 = vector.load %arg22[%c0_59, %c0_60] : memref<48x128xf32, #tpu.memory_space<vmem>>, vector<48x128xf32>
      tpu.vector_store %arg22[%c0_59, %c0_60], %87 {strides = array<i32>} : memref<48x128xf32, #tpu.memory_space<vmem>>, vector<48x128xf32>,
    } else {
    }
    %c0 = arith.constant 0 : index
    %c0_1 = arith.constant 0 : index
    %3 = vector.load %arg21[%c0, %c0_1] : memref<16x128xf32, #tpu.memory_space<vmem>>, vector<16x128xf32>
    %c0_2 = arith.constant 0 : index
    %c0_3 = arith.constant 0 : index
    %4 = vector.load %arg22[%c0_2, %c0_3] : memref<48x128xf32, #tpu.memory_space<vmem>>, vector<48x128xf32>
    %5 = arith.truncf %3 : vector<16x128xf32> to vector<16x128xbf16>
    %c0_4 = arith.constant 0 : index
    %c0_5 = arith.constant 0 : index
    %c0_6 = arith.constant 0 : index
    %6 = vector.load %arg6[%c0_4, %c0_5, %c0_6] : memref<1x128x512xbf16, #tpu.memory_space<vmem>>, vector<1x128x512xbf16>
    %7 = vector.shape_cast %6 : vector<1x128x512xbf16> to vector<128x512xbf16>
    %cst = arith.constant dense<0.000000e+00> : vector<16x512xf32>
    %8 = tpu.matmul %5, %7, %cst {dimension_numbers = #tpu.dot_dimension_numbers<[1], [0], [0], [1], [0, 0, 1, 1], [], []>} : vector<16x128xbf16>, vector<128x512xbf16>, vector<16x512xf32> -> vector<16x512xf32>
    %c0_7 = arith.constant 0 : index
    %c0_8 = arith.constant 0 : index
    %c0_9 = arith.constant 0 : index
    %9 = vector.load %arg7[%c0_7, %c0_8, %c0_9] : memref<1x1x512xf32, #tpu.memory_space<vmem>>, vector<1x1x512xf32>
    %10 = vector.shape_cast %9 : vector<1x1x512xf32> to vector<1x512xf32>
    %11 = vector.broadcast %10 : vector<1x512xf32> to vector<16x512xf32>
    %12 = arith.addf %8, %11 : vector<16x512xf32>
    %13 = vector.extract_strided_slice %12 {offsets = [0, 0], sizes = [16, 128], strides = [1, 1]} : vector<16x512xf32> to vector<16x128xf32>
    %14 = vector.extract_strided_slice %12 {offsets = [0, 128], sizes = [16, 256], strides = [1, 1]} : vector<16x512xf32> to vector<16x256xf32>
    %15 = vector.extract_strided_slice %12 {offsets = [0, 384], sizes = [16, 128], strides = [1, 1]} : vector<16x512xf32> to vector<16x128xf32>
    %16 = arith.truncf %4 : vector<48x128xf32> to vector<48x128xbf16>
    %c0_10 = arith.constant 0 : index
    %c0_11 = arith.constant 0 : index
    %c0_12 = arith.constant 0 : index
    %17 = vector.load %arg8[%c0_10, %c0_11, %c0_12] : memref<1x128x128xbf16, #tpu.memory_space<vmem>>, vector<1x128x128xbf16>
    %18 = vector.shape_cast %17 : vector<1x128x128xbf16> to vector<128x128xbf16>
    %cst_13 = arith.constant dense<0.000000e+00> : vector<48x128xf32>
    %19 = tpu.matmul %16, %18, %cst_13 {dimension_numbers = #tpu.dot_dimension_numbers<[1], [0], [0], [1], [0, 0, 1, 1], [], []>} : vector<48x128xbf16>, vector<128x128xbf16>, vector<48x128xf32> -> vector<48x128xf32>
    %c0_14 = arith.constant 0 : index
    %c0_15 = arith.constant 0 : index
    %c0_16 = arith.constant 0 : index
    %20 = vector.load %arg9[%c0_14, %c0_15, %c0_16] : memref<1x1x128xf32, #tpu.memory_space<vmem>>, vector<1x1x128xf32>
    %21 = vector.shape_cast %20 : vector<1x1x128xf32> to vector<1x128xf32>
    %22 = vector.broadcast %21 : vector<1x128xf32> to vector<48x128xf32>
    %23 = arith.addf %19, %22 : vector<48x128xf32>
    %c0_17 = arith.constant 0 : index
    %c0_18 = arith.constant 0 : index
    %24 = vector.load %arg3[%c0_17, %c0_18] : memref<48x16xbf16, #tpu.memory_space<vmem>>, vector<48x16xbf16>
    %25 = arith.truncf %14 : vector<16x256xf32> to vector<16x256xbf16>
    %cst_19 = arith.constant dense<0.000000e+00> : vector<48x256xf32>
    %26 = tpu.matmul %24, %25, %cst_19 {dimension_numbers = #tpu.dot_dimension_numbers<[1], [0], [0], [1], [0, 0, 1, 1], [], []>} : vector<48x16xbf16>, vector<16x256xbf16>, vector<48x256xf32> -> vector<48x256xf32>
    %27 = vector.extract_strided_slice %26 {offsets = [0, 0], sizes = [48, 128], strides = [1, 1]} : vector<48x256xf32> to vector<48x128xf32>
    %28 = vector.extract_strided_slice %26 {offsets = [0, 128], sizes = [48, 128], strides = [1, 1]} : vector<48x256xf32> to vector<48x128xf32>
    %c0_20 = arith.constant 0 : index
    %c0_21 = arith.constant 0 : index
    %29 = vector.load %arg4[%c0_20, %c0_21] : memref<48x16xbf16, #tpu.memory_space<vmem>>, vector<48x16xbf16>
    %30 = arith.truncf %15 : vector<16x128xf32> to vector<16x128xbf16>
    %cst_22 = arith.constant dense<0.000000e+00> : vector<48x128xf32>
    %31 = tpu.matmul %29, %30, %cst_22 {dimension_numbers = #tpu.dot_dimension_numbers<[1], [0], [0], [1], [0, 0, 1, 1], [], []>} : vector<48x16xbf16>, vector<16x128xbf16>, vector<48x128xf32> -> vector<48x128xf32>
    %32 = arith.addf %28, %31 : vector<48x128xf32>
    %33 = arith.addf %32, %23 : vector<48x128xf32>
    %34 = arith.negf %33 : vector<48x128xf32>
    %35 = math.exp %34 : vector<48x128xf32>
    %cst_23 = arith.constant 1.000000e+00 : f32
    %36 = vector.broadcast %cst_23 : f32 to vector<48x128xf32>
    %37 = arith.addf %36, %35 : vector<48x128xf32>
    %38 = arith.divf %36, %37 : vector<48x128xf32>
    %39 = arith.mulf %38, %27 : vector<48x128xf32>
    %40 = arith.truncf %39 : vector<48x128xf32> to vector<48x128xbf16>
    %c0_24 = arith.constant 0 : index
    %c0_25 = arith.constant 0 : index
    %41 = vector.load %arg23[%c0_24, %c0_25] : memref<48x256xbf16, #tpu.memory_space<vmem>>, vector<48x128xbf16>
    tpu.vector_store %arg23[%c0_24, %c0_25], %40 {strides = array<i32>} : memref<48x256xbf16, #tpu.memory_space<vmem>>, vector<48x128xbf16>,
    %42 = arith.truncf %38 : vector<48x128xf32> to vector<48x128xbf16>
    %c0_26 = arith.constant 0 : index
    %c128 = arith.constant 128 : index
    %43 = vector.load %arg23[%c0_26, %c128] : memref<48x256xbf16, #tpu.memory_space<vmem>>, vector<48x128xbf16>
    tpu.vector_store %arg23[%c0_26, %c128], %42 {strides = array<i32>} : memref<48x256xbf16, #tpu.memory_space<vmem>>, vector<48x128xbf16>,
    %c0_27 = arith.constant 0 : index
    %c0_28 = arith.constant 0 : index
    %44 = vector.load %arg5[%c0_27, %c0_28] : memref<16x48xbf16, #tpu.memory_space<vmem>>, vector<16x48xbf16>
    %c0_29 = arith.constant 0 : index
    %c0_30 = arith.constant 0 : index
    %45 = vector.load %arg23[%c0_29, %c0_30] : memref<48x256xbf16, #tpu.memory_space<vmem>>, vector<48x256xbf16>
    %cst_31 = arith.constant dense<0.000000e+00> : vector<16x256xf32>
    %46 = tpu.matmul %44, %45, %cst_31 {dimension_numbers = #tpu.dot_dimension_numbers<[1], [0], [0], [1], [0, 0, 1, 1], [], []>} : vector<16x48xbf16>, vector<48x256xbf16>, vector<16x256xf32> -> vector<16x256xf32>
    %47 = vector.extract_strided_slice %46 {offsets = [0, 0], sizes = [16, 128], strides = [1, 1]} : vector<16x256xf32> to vector<16x128xf32>
    %48 = vector.extract_strided_slice %46 {offsets = [0, 128], sizes = [16, 128], strides = [1, 1]} : vector<16x256xf32> to vector<16x128xf32>
    %cst_32 = arith.constant 9.99999997E-7 : f32
    %49 = vector.broadcast %cst_32 : f32 to vector<16x128xf32>
    %50 = arith.addf %48, %49 : vector<16x128xf32>
    %51 = tpu.reciprocal %50 {approx = true} : vector<16x128xf32> -> vector<16x128xf32>
    %52 = arith.mulf %50, %51 : vector<16x128xf32>
    %cst_33 = arith.constant 2.000000e+00 : f32
    %53 = vector.broadcast %cst_33 : f32 to vector<16x128xf32>
    %54 = arith.subf %53, %52 : vector<16x128xf32>
    %55 = arith.mulf %51, %54 : vector<16x128xf32>
    %56 = arith.mulf %47, %55 : vector<16x128xf32>
    %57 = arith.addf %13, %56 : vector<16x128xf32>
    %c0_34 = arith.constant 0 : index
    %c0_35 = arith.constant 0 : index
    %c0_36 = arith.constant 0 : index
    %58 = vector.load %arg10[%c0_34, %c0_35, %c0_36] : memref<1x1x128xf32, #tpu.memory_space<vmem>>, vector<1x1x128xf32>
    %59 = vector.shape_cast %58 : vector<1x1x128xf32> to vector<1x128xf32>
    %60 = vector.broadcast %59 : vector<1x128xf32> to vector<16x128xf32>
    %61 = arith.mulf %57, %60 : vector<16x128xf32>
    %c0_37 = arith.constant 0 : index
    %c0_38 = arith.constant 0 : index
    %c0_39 = arith.constant 0 : index
    %62 = vector.load %arg11[%c0_37, %c0_38, %c0_39] : memref<1x1x128xf32, #tpu.memory_space<vmem>>, vector<1x1x128xf32>
    %63 = vector.shape_cast %62 : vector<1x1x128xf32> to vector<1x128xf32>
    %64 = vector.broadcast %63 : vector<1x128xf32> to vector<16x128xf32>
    %65 = arith.addf %61, %64 : vector<16x128xf32>
    %c0_40 = arith.constant 0 : index
    %c0_41 = arith.constant 0 : index
    %c0_42 = arith.constant 0 : index
    %66 = vector.load %arg12[%c0_40, %c0_41, %c0_42] : memref<1x1x128xf32, #tpu.memory_space<vmem>>, vector<1x1x128xf32>
    %67 = vector.shape_cast %66 : vector<1x1x128xf32> to vector<1x128xf32>
    %68 = vector.broadcast %67 : vector<1x128xf32> to vector<48x128xf32>
    %69 = arith.mulf %33, %68 : vector<48x128xf32>
    %c0_43 = arith.constant 0 : index
    %c0_44 = arith.constant 0 : index
    %c0_45 = arith.constant 0 : index
    %70 = vector.load %arg13[%c0_43, %c0_44, %c0_45] : memref<1x1x128xf32, #tpu.memory_space<vmem>>, vector<1x1x128xf32>
    %71 = vector.shape_cast %70 : vector<1x1x128xf32> to vector<1x128xf32>
    %72 = vector.broadcast %71 : vector<1x128xf32> to vector<48x128xf32>
    %73 = arith.addf %69, %72 : vector<48x128xf32>
    %cst_46 = arith.constant 0.000000e+00 : f32
    %74 = vector.broadcast %cst_46 : f32 to vector<16x128xf32>
    %75 = arith.maximumf %65, %74 : vector<16x128xf32>
    %cst_47 = arith.constant 0.000000e+00 : f32
    %76 = vector.broadcast %cst_47 : f32 to vector<48x128xf32>
    %77 = arith.maximumf %73, %76 : vector<48x128xf32>
    %78 = arith.addf %3, %75 : vector<16x128xf32>
    %79 = arith.addf %4, %77 : vector<48x128xf32>
    %c0_48 = arith.constant 0 : index
    %c0_49 = arith.constant 0 : index
    %80 = vector.load %arg21[%c0_48, %c0_49] : memref<16x128xf32, #tpu.memory_space<vmem>>, vector<16x128xf32>
    tpu.vector_store %arg21[%c0_48, %c0_49], %78 {strides = array<i32>} : memref<16x128xf32, #tpu.memory_space<vmem>>, vector<16x128xf32>,
    %c0_50 = arith.constant 0 : index
    %c0_51 = arith.constant 0 : index
    %81 = vector.load %arg22[%c0_50, %c0_51] : memref<48x128xf32, #tpu.memory_space<vmem>>, vector<48x128xf32>
    tpu.vector_store %arg22[%c0_50, %c0_51], %79 {strides = array<i32>} : memref<48x128xf32, #tpu.memory_space<vmem>>, vector<48x128xf32>,
    %c1_i32 = arith.constant 1 : i32
    %82 = arith.cmpi eq, %arg0, %c1_i32 : i32
    %83 = arith.extui %82 : i1 to i32
    %c0_i32_52 = arith.constant 0 : i32
    %84 = arith.cmpi ne, %83, %c0_i32_52 : i32
    scf.if %84 {
      %cst_53 = arith.constant dense<0.000000e+00> : vector<128xf32>
      %85 = vector.multi_reduction <add>, %78, %cst_53 [0] : vector<16x128xf32> to vector<128xf32>
      %86 = vector.shape_cast %85 : vector<128xf32> to vector<1x128xf32>
      %cst_54 = arith.constant 6.250000e-02 : f32
      %87 = vector.broadcast %cst_54 : f32 to vector<1x128xf32>
      %88 = arith.mulf %86, %87 : vector<1x128xf32>
      %89 = arith.truncf %88 : vector<1x128xf32> to vector<1x128xbf16>
      %c0_55 = arith.constant 0 : index
      %c0_56 = arith.constant 0 : index
      %90 = vector.load %arg14[%c0_55, %c0_56] : memref<128x128xbf16, #tpu.memory_space<vmem>>, vector<128x128xbf16>
      %cst_57 = arith.constant dense<0.000000e+00> : vector<1x128xf32>
      %91 = tpu.matmul %89, %90, %cst_57 {dimension_numbers = #tpu.dot_dimension_numbers<[1], [0], [0], [1], [0, 0, 1, 1], [], []>} : vector<1x128xbf16>, vector<128x128xbf16>, vector<1x128xf32> -> vector<1x128xf32>
      %c0_58 = arith.constant 0 : index
      %c0_59 = arith.constant 0 : index
      %92 = vector.load %arg15[%c0_58, %c0_59] : memref<1x128xf32, #tpu.memory_space<vmem>>, vector<1x128xf32>
      %93 = arith.addf %91, %92 : vector<1x128xf32>
      %cst_60 = arith.constant 0.000000e+00 : f32
      %94 = vector.broadcast %cst_60 : f32 to vector<1x128xf32>
      %95 = arith.maximumf %93, %94 : vector<1x128xf32>
      %96 = arith.truncf %95 : vector<1x128xf32> to vector<1x128xbf16>
      %c0_61 = arith.constant 0 : index
      %c0_62 = arith.constant 0 : index
      %97 = vector.load %arg16[%c0_61, %c0_62] : memref<128x128xbf16, #tpu.memory_space<vmem>>, vector<128x128xbf16>
      %cst_63 = arith.constant dense<0.000000e+00> : vector<1x128xf32>
      %98 = tpu.matmul %96, %97, %cst_63 {dimension_numbers = #tpu.dot_dimension_numbers<[1], [0], [0], [1], [0, 0, 1, 1], [], []>} : vector<1x128xbf16>, vector<128x128xbf16>, vector<1x128xf32> -> vector<1x128xf32>
      %c0_64 = arith.constant 0 : index
      %c0_65 = arith.constant 0 : index
      %99 = vector.load %arg17[%c0_64, %c0_65] : memref<1x128xf32, #tpu.memory_space<vmem>>, vector<1x128xf32>
      %100 = arith.addf %98, %99 : vector<1x128xf32>
      %cst_66 = arith.constant 0.000000e+00 : f32
      %101 = vector.broadcast %cst_66 : f32 to vector<1x128xf32>
      %102 = arith.maximumf %100, %101 : vector<1x128xf32>
      %103 = arith.truncf %102 : vector<1x128xf32> to vector<1x128xbf16>
      %c0_67 = arith.constant 0 : index
      %c0_68 = arith.constant 0 : index
      %104 = vector.load %arg18[%c0_67, %c0_68] : memref<128x128xbf16, #tpu.memory_space<vmem>>, vector<128x128xbf16>
      %cst_69 = arith.constant dense<0.000000e+00> : vector<1x128xf32>
      %105 = tpu.matmul %103, %104, %cst_69 {dimension_numbers = #tpu.dot_dimension_numbers<[1], [0], [0], [1], [0, 0, 1, 1], [], []>} : vector<1x128xbf16>, vector<128x128xbf16>, vector<1x128xf32> -> vector<1x128xf32>
      %c0_70 = arith.constant 0 : index
      %c0_71 = arith.constant 0 : index
      %106 = vector.load %arg19[%c0_70, %c0_71] : memref<1x128xf32, #tpu.memory_space<vmem>>, vector<1x128xf32>
      %107 = arith.addf %105, %106 : vector<1x128xf32>
      %c0_72 = arith.constant 0 : index
      %c0_73 = arith.constant 0 : index
      %108 = vector.load %arg20[%c0_72, %c0_73] : memref<1x128xf32, #tpu.memory_space<vmem>>, vector<1x128xf32>
      tpu.vector_store %arg20[%c0_72, %c0_73], %107 {strides = array<i32>} : memref<1x128xf32, #tpu.memory_space<vmem>>, vector<1x128xf32>,
    } else {
    }
    return
  }
  func.func @transform_0(%arg0: i32) -> (i32, i32) {
    %c0_i32 = arith.constant 0 : i32
    %c0_i32_0 = arith.constant 0 : i32
    %c0_i32_1 = arith.constant 0 : i32
    return %c0_i32, %c0_i32_0 : i32, i32
  }
  func.func @transform_1(%arg0: i32) -> (i32, i32) {
    %c0_i32 = arith.constant 0 : i32
    %c0_i32_0 = arith.constant 0 : i32
    %c0_i32_1 = arith.constant 0 : i32
    return %c0_i32, %c0_i32_0 : i32, i32
  }
  func.func @transform_2(%arg0: i32) -> (i32, i32) {
    %c0_i32 = arith.constant 0 : i32
    %c0_i32_0 = arith.constant 0 : i32
    %c0_i32_1 = arith.constant 0 : i32
    return %c0_i32, %c0_i32_0 : i32, i32
  }
  func.func @transform_3(%arg0: i32) -> (i32, i32) {
    %c0_i32 = arith.constant 0 : i32
    %c0_i32_0 = arith.constant 0 : i32
    %c0_i32_1 = arith.constant 0 : i32
    return %c0_i32, %c0_i32_0 : i32, i32
  }
  func.func @transform_4(%arg0: i32) -> (i32, i32) {
    %c0_i32 = arith.constant 0 : i32
    %c0_i32_0 = arith.constant 0 : i32
    %c0_i32_1 = arith.constant 0 : i32
    return %c0_i32, %c0_i32_0 : i32, i32
  }
  func.func @transform_5(%arg0: i32) -> (i32, i32, i32) {
    %c0_i32 = arith.constant 0 : i32
    %c0_i32_0 = arith.constant 0 : i32
    %c0_i32_1 = arith.constant 0 : i32
    return %arg0, %c0_i32, %c0_i32_0 : i32, i32, i32
  }
  func.func @transform_6(%arg0: i32) -> (i32, i32, i32) {
    %c0_i32 = arith.constant 0 : i32
    %c0_i32_0 = arith.constant 0 : i32
    %c0_i32_1 = arith.constant 0 : i32
    return %arg0, %c0_i32, %c0_i32_0 : i32, i32, i32
  }
  func.func @transform_7(%arg0: i32) -> (i32, i32, i32) {
    %c0_i32 = arith.constant 0 : i32
    %c0_i32_0 = arith.constant 0 : i32
    %c0_i32_1 = arith.constant 0 : i32
    return %arg0, %c0_i32, %c0_i32_0 : i32, i32, i32
  }
  func.func @transform_8(%arg0: i32) -> (i32, i32, i32) {
    %c0_i32 = arith.constant 0 : i32
    %c0_i32_0 = arith.constant 0 : i32
    %c0_i32_1 = arith.constant 0 : i32
    return %arg0, %c0_i32, %c0_i32_0 : i32, i32, i32
  }
  func.func @transform_9(%arg0: i32) -> (i32, i32, i32) {
    %c0_i32 = arith.constant 0 : i32
    %c0_i32_0 = arith.constant 0 : i32
    %c0_i32_1 = arith.constant 0 : i32
    return %arg0, %c0_i32, %c0_i32_0 : i32, i32, i32
  }
  func.func @transform_10(%arg0: i32) -> (i32, i32, i32) {
    %c0_i32 = arith.constant 0 : i32
    %c0_i32_0 = arith.constant 0 : i32
    %c0_i32_1 = arith.constant 0 : i32
    return %arg0, %c0_i32, %c0_i32_0 : i32, i32, i32
  }
  func.func @transform_11(%arg0: i32) -> (i32, i32, i32) {
    %c0_i32 = arith.constant 0 : i32
    %c0_i32_0 = arith.constant 0 : i32
    %c0_i32_1 = arith.constant 0 : i32
    return %arg0, %c0_i32, %c0_i32_0 : i32, i32, i32
  }
  func.func @transform_12(%arg0: i32) -> (i32, i32, i32) {
    %c0_i32 = arith.constant 0 : i32
    %c0_i32_0 = arith.constant 0 : i32
    %c0_i32_1 = arith.constant 0 : i32
    return %arg0, %c0_i32, %c0_i32_0 : i32, i32, i32
  }
  func.func @transform_13(%arg0: i32) -> (i32, i32) {
    %c0_i32 = arith.constant 0 : i32
    %c0_i32_0 = arith.constant 0 : i32
    %c0_i32_1 = arith.constant 0 : i32
    return %c0_i32, %c0_i32_0 : i32, i32
  }
  func.func @transform_14(%arg0: i32) -> (i32, i32) {
    %c0_i32 = arith.constant 0 : i32
    %c0_i32_0 = arith.constant 0 : i32
    %c0_i32_1 = arith.constant 0 : i32
    return %c0_i32, %c0_i32_0 : i32, i32
  }
  func.func @transform_15(%arg0: i32) -> (i32, i32) {
    %c0_i32 = arith.constant 0 : i32
    %c0_i32_0 = arith.constant 0 : i32
    %c0_i32_1 = arith.constant 0 : i32
    return %c0_i32, %c0_i32_0 : i32, i32
  }
  func.func @transform_16(%arg0: i32) -> (i32, i32) {
    %c0_i32 = arith.constant 0 : i32
    %c0_i32_0 = arith.constant 0 : i32
    %c0_i32_1 = arith.constant 0 : i32
    return %c0_i32, %c0_i32_0 : i32, i32
  }
  func.func @transform_17(%arg0: i32) -> (i32, i32) {
    %c0_i32 = arith.constant 0 : i32
    %c0_i32_0 = arith.constant 0 : i32
    %c0_i32_1 = arith.constant 0 : i32
    return %c0_i32, %c0_i32_0 : i32, i32
  }
  func.func @transform_18(%arg0: i32) -> (i32, i32) {
    %c0_i32 = arith.constant 0 : i32
    %c0_i32_0 = arith.constant 0 : i32
    %c0_i32_1 = arith.constant 0 : i32
    return %c0_i32, %c0_i32_0 : i32, i32
  }
  func.func @transform_19(%arg0: i32) -> (i32, i32) {
    %c0_i32 = arith.constant 0 : i32
    %c0_i32_0 = arith.constant 0 : i32
    %c0_i32_1 = arith.constant 0 : i32
    return %c0_i32, %c0_i32_0 : i32, i32
  }
}

</mosaic_0001>

<bundles_post_ra>
// kernel: tpu_custom_call.1
= control target key start
LH: loop header
LB: loop body
LE: loop exit
PB: predicated region body
PF: predicated region fallthrough
CT: control target
= control target key end

     0   :  { %s4335_s0 = inlined_call_operand.hbm [shape: f32[16,128], index: 0, kind: input, shape index: {}]   ;;  %s4336_s1 = inlined_call_operand.hbm [shape: f32[48,128], index: 1, kind: input, shape index: {}]   ;;  %s4337_s2 = inlined_call_operand.vmem [shape: bf16[48,16], index: 2, kind: input, shape index: {}]   ;;  %s4338_s3 = inlined_call_operand.vmem [shape: bf16[48,16], index: 3, kind: input, shape index: {}]   ;;  %s4339_s4 = inlined_call_operand.hbm [shape: bf16[16,48], index: 4, kind: input, shape index: {}]   ;;  %s4340_s5 = inlined_call_operand.hbm [shape: bf16[2,128,512], index: 5, kind: input, shape index: {}]   ;;  %s4341_s6 = inlined_call_operand.hbm [shape: f32[2,1,512], index: 6, kind: input, shape index: {}]   ;;  %s4342_s7 = inlined_call_operand.hbm [shape: bf16[2,128,128], index: 7, kind: input, shape index: {}]   ;;  %s4343_s8 = inlined_call_operand.hbm [shape: f32[2,1,128], index: 8, kind: input, shape index: {}]   ;;  %s4344_s9 = inlined_call_operand.hbm [shape: f32[2,1,128], index: 9, kind: input, shape index: {}]   ;;  %s4345_s10 = inlined_call_operand.hbm [shape: f32[2,1,128], index: 10, kind: input, shape index: {}]   ;;  %s4346_s11 = inlined_call_operand.hbm [shape: f32[2,1,128], index: 11, kind: input, shape index: {}]   ;;  %s4347_s12 = inlined_call_operand.hbm [shape: f32[2,1,128], index: 12, kind: input, shape index: {}]   ;;  %s4348_s13 = inlined_call_operand.vmem [shape: bf16[128,128], index: 13, kind: input, shape index: {}]   ;;  %s4349_s14 = inlined_call_operand.hbm [shape: f32[1,128], index: 14, kind: input, shape index: {}]   ;;  %s4350_s15 = inlined_call_operand.hbm [shape: bf16[128,128], index: 15, kind: input, shape index: {}]   ;;  %s4351_s16 = inlined_call_operand.hbm [shape: f32[1,128], index: 16, kind: input, shape index: {}]   ;;  %s4352_s17 = inlined_call_operand.vmem [shape: bf16[128,128], index: 17, kind: input, shape index: {}]   ;;  %s4353_s18 = inlined_call_operand.vmem [shape: f32[1,128], index: 18, kind: input, shape index: {}]   ;;  %s4354_s19 = inlined_call_operand.hbm [shape: f32[1,128], index: 19, kind: output, shape index: {}]  }
   0x1   :  { %4394 = sst [smem:[#allocation45_spill]] %s4335_s0 }
   0x2   :  { %4395 = sst [smem:[#allocation46_spill]] %s4336_s1 }
   0x3   :  { %4396 = sst [smem:[#allocation47_spill]] %s4337_s2 }
   0x4   :  { %4397 = sst [smem:[#allocation48_spill]] %s4338_s3 }
   0x5   :  { %4398 = sst [smem:[#allocation49_spill]] %s4340_s5 }
   0x6   :  { %4399 = sst [smem:[#allocation50_spill]] %s4342_s7 }
   0x7   :  { %4400 = sst [smem:[#allocation51_spill]] %s4344_s9 }
   0x8   :  { %4401 = sst [smem:[#allocation52_spill]] %s4347_s12 }
   0x9   :  { %4402 = sst [smem:[#allocation53_spill]] %s4348_s13 }
   0xa   :  { %4403 = sst [smem:[#allocation54_spill]] %s4349_s14 }
   0xb   :  { %4404 = sst [smem:[#allocation55_spill]] %s4352_s17 }
   0xc   :  { %4405 = sst [smem:[#allocation56_spill]] %s4353_s18 }
   0xd   :  { %4406 = sst [smem:[#allocation57_spill]] %s4354_s19 }
   0xe   :  { %24 = vsyncpa [#allocation6], 0 }
   0xf   :  { %25 = vsyncpa [#allocation9], 0 }
  0x10   :  { %26 = vsyncpa [#allocation12], 0 }
  0x11   :  { %28 = vsyncpa [#allocation12 + $0x1], 0 }
  0x12   :  { %29 = vsyncpa [#allocation15], 0 }
  0x13   :  { %31 = vsyncpa [#allocation15 + $0x1], 0 }
  0x14   :  { %32 = vsyncpa [#allocation18], 0 }
  0x15   :  { %34 = vsyncpa [#allocation18 + $0x1], 0 }
  0x16   :  { %35 = vsyncpa [#allocation21], 0 }
  0x17   :  { %37 = vsyncpa [#allocation21 + $0x1], 0 }
  0x18   :  { %38 = vsyncpa [#allocation24], 0 }
  0x19   :  { %39 = vsyncpa [#allocation27], 0 }
  0x1a   :  { %40 = vsyncpa [#allocation7], 0  ;;  %s3537_s0 = smov 0   ;;  %s3539_s30 = smov 0  }
  0x1b   :  { %s3541_s20 = smov 0   ;;  %s3543_s21 = smov 0  }
  0x1c LB: > { %4407 = sst [smem:[#allocation38_spill]] %s3401_s30  ;;  %s3556_s1 = sadd.s32 4294967295, %s3409_s21   ;;  %s3409_s21 = sphi %s3543_s21, %s4469_s21   ;;  %s3405_s20 = sphi %s3541_s20, %s4472_s20   ;;  %s3401_s30 = sphi %s3539_s30, %s4471_s30   ;;  %s3397_s0 = sphi %s3537_s0, %s4470_s0  }
  0x1d   : > { %4408 = sst [smem:[#allocation39_spill]] %s3405_s20  ;;  %p171_p0 = scmp.ne.s32.totalorder %s3401_s30, %s3397_s0 }
  0x1e   : > { %4409 = sst [smem:[#allocation40_spill]] %s3556_s1  ;;  %p4361_p1 = scmp.eq.s32.totalorder %s3556_s1, 0 }
  0x1f   : > { %p2367_p2 = scmp.ge.s32.totalorder %s3409_s21, 1  ;;  %p511_p3 = scmp.lt.s32.totalorder %s3409_s21, 3 }
  0x20   : > { %p3565_p5 = por %p4361_p1, %p171_p0  ;;  %s3411_s23 = smov [#allocation8]  }
  0x21   : > { %p3569_p6 = pnand %p2367_p2, %p511_p3  ;;  %s536_s24 = sshll.u32 %s3411_s23, 4  ;;  %s537_s24 = int_to_ptr.vmem [resolvable:$true] %s536_s24 }
  0x22   : > { %s4410_s22 = scalar_select %p3565_p5, 1, 0 }
  0x23   : > { %s4412_s2 = scalar_select %p3569_p6, 1, 0 }
  0x24   : > { %4411 = sst [smem:[#allocation41_spill]] %s4410_s22  ;;  %p2685_p7 = pneg %p3569_p6 }
  0x25   : > { %4413 = sst [smem:[#allocation42_spill]] %s4412_s2  ;;  %s3412_s3 = smov [#allocation23]  }
  0x26   : > { %p3577_p8 = pnand %p2685_p7, %p4361_p1  ;;  %s572_s26 = sshll.u32 %s3412_s3, 4  ;;  %s3581_s26 = int_to_ptr.vmem [resolvable:$true] %s572_s26 }
  0x27   : > { %s4415_s29 = sld [smem:[#allocation46_spill]] }
  0x28   : > { %s4414_s25 = scalar_select %p3577_p8, 1, 0 }
  0x29   : > { %p3591_p10 = pneg %p3577_p8 }
  0x2b   : > { %s4416_s23 = scalar_select %p3591_p10, 1, 0 }
  0x2d   : > { %s2909_s0 = scalar_lea.hbm %s4415_s29, 768 }
  0x2e   : > { %p2910_p9 = scmp.ne.s32.totalorder %s4415_s29, %s2909_s0  ;;  %p2916_p13 = scmp.lt.u32.totalorder %s2909_s0, %s4415_s29 }
  0x30   : > { %p2912_p11 = pnand %p3591_p10, %p2910_p9 }
  0x32   : > { %p2913_p12 = pneg %p2912_p11 }
  0x34   : > { %p2918_p0 = pnand %p2916_p13, %p2913_p12 }
  0x36   : > { %2921 = shalt.err (!%p2918_p0)
}
  0x37   : > { %s2922_s27 = scalar_lea.vmem %s537_s24, 768  ;;  %p2930_p4 = scmp.lt.s32.totalorder %s537_s24, %s537_s24 }
  0x38   : > { %p2923_p2 = scmp.ne.s32.totalorder %s537_s24, %s2922_s27  ;;  %p2931_p1 = scmp.lt.s32.totalorder %s2922_s27, %s2922_s27 }
  0x3a   : > { %p2925_p3 = pnand %p2923_p2, %p3591_p10  ;;  %p2932_p5 = por %p2931_p1, %p2930_p4 }
  0x3c   : > { %p2926_p7 = pneg %p2925_p3 }
  0x3e   : > { %p2933_p6 = pnand %p2932_p5, %p2926_p7 }
  0x40   : > { %2936 = shalt.err (!%p2933_p6)
}
  0x41   : > { %s4371_s18 = smov 128   ;;  %s4372_s19 = smov 8  }
  0x42   : > { %2691 = dma.hbm_to_vmem [thread:$0]  (!%p3577_p8), %s4415_s29, 768, %s537_s24, [#allocation9], %s4371_s18, %s4371_s18, %s4372_s19  }
  0x43   : > { %s4417_s14 = sld [smem:[#allocation54_spill]] }
  0x49   : > { %s2937_s13 = scalar_lea.hbm %s4417_s14, 16 }
  0x4a   : > { %p2938_p1 = scmp.ne.s32.totalorder %s4417_s14, %s2937_s13  ;;  %p2944_p6 = scmp.lt.u32.totalorder %s2937_s13, %s4417_s14 }
  0x4c   : > { %p2940_p4 = pnand %p2938_p1, %p3591_p10 }
  0x4e   : > { %p2941_p5 = pneg %p2940_p4 }
  0x50   : > { %p2946_p9 = pnand %p2944_p6, %p2941_p5 }
  0x52   : > { %2949 = shalt.err (!%p2946_p9)
}
  0x53   : > { %s2950_s24 = scalar_lea.vmem %s3581_s26, 16  ;;  %s2957_s22 = scalar_lea.vmem %s3581_s26, 32 }
  0x54   : > { %p2951_p11 = scmp.ne.s32.totalorder %s3581_s26, %s2950_s24  ;;  %p2958_p0 = scmp.lt.s32.totalorder %s3581_s26, %s3581_s26 }
  0x55   : > { %p2959_p2 = scmp.lt.s32.totalorder %s2957_s22, %s2950_s24 }
  0x56   : > { %p2953_p12 = pnand %p2951_p11, %p3591_p10 }
  0x57   : > { %p2960_p3 = por %p2959_p2, %p2958_p0 }
  0x58   : > { %p2954_p13 = pneg %p2953_p12 }
  0x5a   : > { %p2961_p7 = pnand %p2960_p3, %p2954_p13 }
  0x5c   : > { %2964 = shalt.err (!%p2961_p7)
}
  0x5d   : > { %2697 = dma.hbm_to_vmem [thread:$0]  (!%p3577_p8), %s4417_s14, 16, %s3581_s26, [#allocation24]  }
  0x5e   : > { %s3635_s2 = sadd.s32 1, %s3409_s21   ;;  %s158_s17 = sadd.s32 1, %s3405_s20 }
  0x5f   : > { %4418 = sst [smem:[#allocation43_spill]] %s3635_s2  ;;  %s155_s28 = ssub.s32 %s3409_s21, %s3635_s2 }
  0x60   : > { %p165_p1 = scmp.ne.s32.totalorder %s3405_s20, %s3401_s30  ;;  %p156_p4 = scmp.eq.s32.totalorder %s155_s28, 0 }
  0x61   : > { %p166_p5 = scmp.eq.s32.totalorder %s3409_s21, 0  ;;  %p2735_p6 = scmp.lt.s32.totalorder %s3409_s21, 2 }
  0x62   : > { %s3645_s0 = sand.u32 1, %s3409_s21   ;;  %s3651_s27 = sand.u32 1, %s3405_s20  }
  0x63   : > { %s3648_s3 = scalar_select %p156_p4, %s3405_s20, %s158_s17  }
  0x64   : > { %p167_p9 = por %p166_p5, %p165_p1  ;;  %s2494_s24 = sshll.u32 %s3409_s21, 12 }
  0x65   : > { %4419 = sst [smem:[#allocation44_spill]] %s3648_s3  ;;  %s2375_s26 = sshll.u32 %s3651_s27, 8 }
  0x66   : > { %s4420_s5 = sld [smem:[#allocation49_spill]]  ;;  %p3660_p11 = pnand %p2735_p6, %p167_p9 }
  0x67   : > { %s617_s17 = scalar_lea.vmem [#allocation11], %s2375_s26 }
  0x68   : > { %s4421_s28 = scalar_select %p3660_p11, 1, 0 }
  0x69   : > { %s624_s18 = sshll.u32 %s617_s17, 4  ;;  %p3671_p13 = pneg %p3660_p11  ;;  %s3664_s18 = int_to_ptr.vmem [resolvable:$true] %s624_s18 }
  0x6c   : > { %s3658_s1 = scalar_lea.hbm %s4420_s5, %s2494_s24  ;;  %s2970_s29 = scalar_lea.hbm %s4420_s5, 8192 }
  0x6d   : > { %s2965_s14 = scalar_lea.hbm %s3658_s1, 4096  ;;  %p2971_p3 = scmp.lt.u32.totalorder %s3658_s1, %s4420_s5 }
  0x6e   : > { %p2966_p12 = scmp.ne.s32.totalorder %s3658_s1, %s2965_s14  ;;  %p2972_p7 = scmp.lt.u32.totalorder %s2970_s29, %s2965_s14 }
  0x6f   : > { %s4422_s24 = scalar_select %p3671_p13, 1, 0 }
  0x70   : > { %p2968_p0 = pnand %p3671_p13, %p2966_p12  ;;  %p2973_p1 = por %p2972_p7, %p2971_p3 }
  0x71   : > { %p2974_p4 = scmp.lt.u32.totalorder %s2965_s14, %s3658_s1 }
  0x72   : > { %p2969_p2 = pneg %p2968_p0 }
  0x73   : > { %p2975_p5 = por %p2974_p4, %p2973_p1 }
  0x75   : > { %p2976_p6 = pnand %p2975_p5, %p2969_p2 }
  0x77   : > { %2979 = shalt.err (!%p2976_p6)
}
  0x78   : > { %s2980_s19 = scalar_lea.vmem %s3664_s18, 4096  ;;  %s3415_s22 = smov [#allocation11]  }
  0x79   : > { %p2981_p9 = scmp.ne.s32.totalorder %s3664_s18, %s2980_s19  ;;  %s2985_s13 = sshll.u32 %s3415_s22, 4  ;;  %s2986_s13 = int_to_ptr.vmem [resolvable:$false] %s2985_s13 }
  0x7a   : > { %s2987_s26 = scalar_lea.vmem %s2986_s13, 8192  ;;  %p2988_p8 = scmp.lt.s32.totalorder %s3664_s18, %s2986_s13 }
  0x7b   : > { %p2983_p12 = pnand %p2981_p9, %p3671_p13  ;;  %p2989_p10 = scmp.lt.s32.totalorder %s2987_s26, %s2980_s19 }
  0x7d   : > { %p2984_p0 = pneg %p2983_p12  ;;  %p2990_p3 = por %p2989_p10, %p2988_p8 }
  0x7f   : > { %p2991_p7 = pnand %p2990_p3, %p2984_p0 }
  0x81   : > { %2994 = shalt.err (!%p2991_p7)
}
  0x82   : > { %s3416_s14 = smov 256   ;;  %s3417_s29 = smov 16  }
  0x83   : > { %s4423_s17 = scalar_lea.sflag [#allocation12], %s3645_s0  ;;  %s2381_s22 = sshll.u32 %s3651_s27, 6 }
  0x84   : > { %2707 = dma.hbm_to_vmem [thread:$0]  (!%p3660_p11), %s3658_s1, 4096, %s3664_s18, %s4423_s17, %s3416_s14, %s3416_s14, %s3417_s29  }
  0x85   : > { %s2496_s13 = sshll.u32 %s3409_s21, 10  ;;  %s4424_s7 = sld [smem:[#allocation50_spill]] }
  0x86   : > { %s657_s3 = scalar_lea.vmem [#allocation14], %s2381_s22  ;;  %s3704_s2 = sshll.u32 %s3409_s21, 4 }
  0x87   : > { %s664_s20 = sshll.u32 %s657_s3, 4  ;;  %s4383_s30 = scalar_lea.sflag [#allocation15], %s3645_s0  ;;  %s3706_s20 = int_to_ptr.vmem [resolvable:$true] %s664_s20 }
  0x8b   : > { %s3701_s5 = scalar_lea.hbm %s4424_s7, %s2496_s13  ;;  %s3000_s14 = scalar_lea.hbm %s4424_s7, 2048 }
  0x8c   : > { %s2995_s12 = scalar_lea.hbm %s3701_s5, 1024  ;;  %p3001_p1 = scmp.lt.u32.totalorder %s3701_s5, %s4424_s7 }
  0x8d   : > { %p2996_p8 = scmp.ne.s32.totalorder %s3701_s5, %s2995_s12  ;;  %p3002_p4 = scmp.lt.u32.totalorder %s3000_s14, %s2995_s12 }
  0x8e   : > { %p3004_p6 = scmp.lt.u32.totalorder %s2995_s12, %s3701_s5 }
  0x8f   : > { %p2998_p10 = pnand %p2996_p8, %p3671_p13  ;;  %p3003_p5 = por %p3002_p4, %p3001_p1 }
  0x91   : > { %p2999_p2 = pneg %p2998_p10  ;;  %p3005_p9 = por %p3004_p6, %p3003_p5 }
  0x93   : > { %p3006_p12 = pnand %p3005_p9, %p2999_p2 }
  0x95   : > { %3009 = shalt.err (!%p3006_p12)
}
  0x96   : > { %s3010_s3 = scalar_lea.vmem %s3706_s20, 1024  ;;  %s3418_s22 = smov [#allocation14]  }
  0x97   : > { %p3011_p0 = scmp.ne.s32.totalorder %s3706_s20, %s3010_s3  ;;  %s3015_s13 = sshll.u32 %s3418_s22, 4  ;;  %s3016_s13 = int_to_ptr.vmem [resolvable:$false] %s3015_s13 }
  0x98   : > { %s3017_s19 = scalar_lea.vmem %s3016_s13, 2048  ;;  %p3018_p8 = scmp.lt.s32.totalorder %s3706_s20, %s3016_s13 }
  0x99   : > { %p3013_p3 = pnand %p3011_p0, %p3671_p13  ;;  %p3019_p10 = scmp.lt.s32.totalorder %s3017_s19, %s3010_s3 }
  0x9b   : > { %p3014_p7 = pneg %p3013_p3  ;;  %p3020_p1 = por %p3019_p10, %p3018_p8 }
  0x9d   : > { %p3021_p4 = pnand %p3020_p1, %p3014_p7 }
  0x9f   : > { %3024 = shalt.err (!%p3021_p4)
}
  0xa0   : > { %s4387_s12 = smov 64   ;;  %s4389_s26 = smov 4  }
  0xa1   : > { %2713 = dma.hbm_to_vmem [thread:$0]  (!%p3660_p11), %s3701_s5, 1024, %s3706_s20, %s4383_s30, %s4387_s12, %s4387_s12, %s4389_s26  }
  0xa2   : > { %s4425_s9 = sld [smem:[#allocation51_spill]]  ;;  %s694_s29 = scalar_lea.vmem [#allocation17], %s3651_s27 }
  0xa3   : > { %s701_s17 = sshll.u32 %s694_s29, 4  ;;  %s4386_s3 = scalar_lea.sflag [#allocation18], %s3645_s0  ;;  %s702_s17 = int_to_ptr.vmem [resolvable:$true] %s701_s17 }
  0xa8   : > { %s3739_s14 = scalar_lea.hbm %s4425_s9, %s3704_s2  ;;  %s3030_s20 = scalar_lea.hbm %s4425_s9, 32 }
  0xa9   : > { %s3025_s22 = scalar_lea.hbm %s3739_s14, 16  ;;  %p3031_p9 = scmp.lt.u32.totalorder %s3739_s14, %s4425_s9 }
  0xaa   : > { %p3026_p2 = scmp.ne.s32.totalorder %s3739_s14, %s3025_s22  ;;  %p3032_p12 = scmp.lt.u32.totalorder %s3030_s20, %s3025_s22 }
  0xab   : > { %p3034_p3 = scmp.lt.u32.totalorder %s3025_s22, %s3739_s14 }
  0xac   : > { %p3028_p5 = pnand %p3026_p2, %p3671_p13  ;;  %p3033_p0 = por %p3032_p12, %p3031_p9 }
  0xae   : > { %p3029_p6 = pneg %p3028_p5  ;;  %p3035_p7 = por %p3034_p3, %p3033_p0 }
  0xb0   : > { %p3036_p8 = pnand %p3035_p7, %p3029_p6 }
  0xb2   : > { %3039 = shalt.err (!%p3036_p8)
}
  0xb3   : > { %s3040_s1 = scalar_lea.vmem %s702_s17, 16  ;;  %s3421_s29 = smov [#allocation17]  }
  0xb4   : > { %p3041_p10 = scmp.ne.s32.totalorder %s702_s17, %s3040_s1  ;;  %s3045_s30 = sshll.u32 %s3421_s29, 4  ;;  %s3046_s30 = int_to_ptr.vmem [resolvable:$false] %s3045_s30 }
  0xb5   : > { %s3047_s13 = scalar_lea.vmem %s3046_s30, 32  ;;  %p3048_p2 = scmp.lt.s32.totalorder %s702_s17, %s3046_s30 }
  0xb6   : > { %p3043_p1 = pnand %p3041_p10, %p3671_p13  ;;  %p3049_p5 = scmp.lt.s32.totalorder %s3047_s13, %s3040_s1 }
  0xb8   : > { %p3044_p4 = pneg %p3043_p1  ;;  %p3050_p11 = por %p3049_p5, %p3048_p2 }
  0xba   : > { %p3051_p9 = pnand %p3050_p11, %p3044_p4 }
  0xbc   : > { %3054 = shalt.err (!%p3051_p9)
}
  0xbd   : > { %p4426_p12 = scmp.ne.s32.totalorder %s4421_s28, 0  ;;  %s3766_s20 = scalar_lea.hbm %s4346_s11, %s3704_s2 }
  0xbe   : > { %s728_s30 = scalar_lea.vmem [#allocation20], %s3651_s27  ;;  %s4393_s18 = scalar_lea.sflag [#allocation21], %s3645_s0 }
  0xbf   : > { %2719 = dma.hbm_to_vmem [thread:$0]  (!%p4426_p12), %s3739_s14, 16, %s702_s17, %s4386_s3  }
  0xc0   : > { %s735_s19 = sshll.u32 %s728_s30, 4  ;;  %s3055_s1 = scalar_lea.hbm %s3766_s20, 16  ;;  %s736_s19 = int_to_ptr.vmem [resolvable:$true] %s735_s19 }
  0xc1   : > { %p3056_p11 = scmp.ne.s32.totalorder %s3766_s20, %s3055_s1  ;;  %s3060_s17 = scalar_lea.hbm %s4346_s11, 32 }
  0xc2   : > { %p3061_p3 = scmp.lt.u32.totalorder %s3766_s20, %s4346_s11  ;;  %p3062_p7 = scmp.lt.u32.totalorder %s3060_s17, %s3055_s1 }
  0xc3   : > { %p3058_p6 = pnand %p3056_p11, %p3671_p13  ;;  %p3064_p10 = scmp.lt.u32.totalorder %s3055_s1, %s3766_s20 }
  0xc4   : > { %p3063_p8 = por %p3062_p7, %p3061_p3 }
  0xc5   : > { %p3059_p0 = pneg %p3058_p6 }
  0xc6   : > { %p3065_p1 = por %p3064_p10, %p3063_p8 }
  0xc8   : > { %p3066_p4 = pnand %p3065_p1, %p3059_p0 }
  0xca   : > { %3069 = shalt.err (!%p3066_p4)
}
  0xcb   : > { %s3070_s5 = scalar_lea.vmem %s736_s19, 16  ;;  %s3422_s30 = smov [#allocation20]  }
  0xcc   : > { %p3071_p2 = scmp.ne.s32.totalorder %s736_s19, %s3070_s5  ;;  %s3075_s3 = sshll.u32 %s3422_s30, 4  ;;  %s3076_s3 = int_to_ptr.vmem [resolvable:$false] %s3075_s3 }
  0xcd   : > { %s3077_s29 = scalar_lea.vmem %s3076_s3, 32  ;;  %p3078_p11 = scmp.lt.s32.totalorder %s736_s19, %s3076_s3 }
  0xce   : > { %p3073_p5 = pnand %p3071_p2, %p3671_p13  ;;  %p3079_p6 = scmp.lt.s32.totalorder %s3077_s29, %s3070_s5 }
  0xd0   : > { %p3074_p9 = pneg %p3073_p5  ;;  %p3080_p12 = por %p3079_p6, %p3078_p11 }
  0xd2   : > { %p3081_p3 = pnand %p3080_p12, %p3074_p9 }
  0xd4   : > { %3084 = shalt.err (!%p3081_p3)
}
  0xd5   : > { %p4427_p7 = scmp.ne.s32.totalorder %s4421_s28, 0  ;;  %s3423_s1 = smov [#allocation5]  }
  0xd6   : > { %s523_s14 = sshll.u32 %s3423_s1, 4  ;;  %s3424_s17 = smov [#allocation10]   ;;  %s524_s14 = int_to_ptr.vmem [resolvable:$true] %s523_s14 }
  0xd7   : > { %2725 = dma.hbm_to_vmem [thread:$0]  (!%p4427_p7), %s3766_s20, 16, %s736_s19, %s4393_s18  }
  0xd8   : > { %s555_s13 = sshll.u32 %s3424_s17, 4  ;;  %s4428_s12 = sld [smem:[#allocation45_spill]]  ;;  %s556_s13 = int_to_ptr.vmem [resolvable:$true] %s555_s13 }
  0xd9   : > { %p4429_p0 = scmp.ne.s32.totalorder %s4416_s23, 0 }
  0xde   : > { %s3085_s3 = scalar_lea.hbm %s4428_s12, 256 }
  0xdf   : > { %p3086_p12 = scmp.ne.s32.totalorder %s4428_s12, %s3085_s3  ;;  %p3092_p1 = scmp.lt.u32.totalorder %s3085_s3, %s4428_s12 }
  0xe1   : > { %p3088_p8 = pnand %p3086_p12, %p4429_p0 }
  0xe3   : > { %p3089_p10 = pneg %p3088_p8 }
  0xe5   : > { %p3094_p4 = pnand %p3092_p1, %p3089_p10 }
  0xe7   : > { %3097 = shalt.err (!%p3094_p4)
}
  0xe8   : > { %s3098_s20 = scalar_lea.vmem %s524_s14, 256  ;;  %p3106_p11 = scmp.lt.s32.totalorder %s524_s14, %s524_s14 }
  0xe9   : > { %p3099_p2 = scmp.ne.s32.totalorder %s524_s14, %s3098_s20  ;;  %p3107_p6 = scmp.lt.s32.totalorder %s3098_s20, %s3098_s20 }
  0xeb   : > { %p3101_p5 = pnand %p3099_p2, %p4429_p0  ;;  %p3108_p3 = por %p3107_p6, %p3106_p11 }
  0xed   : > { %p3102_p9 = pneg %p3101_p5 }
  0xef   : > { %p3109_p7 = pnand %p3108_p3, %p3102_p9 }
  0xf1   : > { %3112 = shalt.err (!%p3109_p7)
}
  0xf2   : > { %p4430_p12 = scmp.ne.s32.totalorder %s4414_s25, 0  ;;  %s4431_s19 = smov 8  }
  0xf3   : > { %s4432_s1 = smov 128   ;;  %s3113_s30 = scalar_lea.hbm %s4339_s4, 128 }
  0xf4   : > { %2688 = dma.hbm_to_vmem [thread:$0]  (!%p4430_p12), %s4428_s12, 256, %s524_s14, [#allocation6], %s4432_s1, %s4432_s1, %s4431_s19  }
  0xf5   : > { %p3114_p8 = scmp.ne.s32.totalorder %s4339_s4, %s3113_s30  ;;  %p3120_p1 = scmp.lt.u32.totalorder %s3113_s30, %s4339_s4 }
  0xf7   : > { %p3116_p7 = pnand %p3114_p8, %p4429_p0 }
  0xf9   : > { %p3117_p10 = pneg %p3116_p7 }
  0xfb   : > { %p3122_p4 = pnand %p3120_p1, %p3117_p10 }
  0xfd   : > { %3125 = shalt.err (!%p3122_p4)
}
  0xfe   : > { %s3126_s7 = scalar_lea.vmem %s556_s13, 128  ;;  %p3134_p11 = scmp.lt.s32.totalorder %s556_s13, %s556_s13 }
  0xff   : > { %p3127_p2 = scmp.ne.s32.totalorder %s556_s13, %s3126_s7  ;;  %p3135_p6 = scmp.lt.s32.totalorder %s3126_s7, %s3126_s7 }
 0x101   : > { %p3129_p5 = pnand %p3127_p2, %p4429_p0  ;;  %p3136_p3 = por %p3135_p6, %p3134_p11 }
 0x103   : > { %p3130_p9 = pneg %p3129_p5 }
 0x105   : > { %p3137_p13 = pnand %p3136_p3, %p3130_p9 }
 0x107   : > { %3140 = shalt.err (!%p3137_p13)
}
 0x108   : > { %s4433_s14 = smov 4   ;;  %s4434_s19 = smov 64  }
 0x109   : > { %2694 = dma.hbm_to_vmem [thread:$0]  (!%p4430_p12), %s4339_s4, 128, %s556_s13, [#allocation9], %s4434_s19, %s4434_s19, %s4433_s14  }
 0x10a   : > { %s3425_s17 = smov [#allocation25]   ;;  %s3426_s30 = smov [#allocation26]  }
 0x10b   : > { %s582_s22 = sshll.u32 %s3425_s17, 4  ;;  %s596_s3 = sshll.u32 %s3426_s30, 4  ;;  %s583_s22 = int_to_ptr.vmem [resolvable:$true] %s582_s22  ;;  %s597_s3 = int_to_ptr.vmem [resolvable:$true] %s596_s3 }
 0x10c   : > { %s3141_s20 = scalar_lea.hbm %s4350_s15, 1024 }
 0x10d   : > { %p3142_p13 = scmp.ne.s32.totalorder %s4350_s15, %s3141_s20  ;;  %p3148_p10 = scmp.lt.u32.totalorder %s3141_s20, %s4350_s15 }
 0x10f   : > { %p3144_p8 = pnand %p3142_p13, %p4429_p0 }
 0x111   : > { %p3145_p7 = pneg %p3144_p8 }
 0x113   : > { %p3150_p1 = pnand %p3148_p10, %p3145_p7 }
 0x115   : > { %3153 = shalt.err (!%p3150_p1)
}
 0x116   : > { %s3154_s13 = scalar_lea.vmem %s583_s22, 1024  ;;  %p3162_p9 = scmp.lt.s32.totalorder %s583_s22, %s583_s22 }
 0x117   : > { %p3155_p4 = scmp.ne.s32.totalorder %s583_s22, %s3154_s13  ;;  %p3163_p11 = scmp.lt.s32.totalorder %s3154_s13, %s3154_s13 }
 0x119   : > { %p3157_p2 = pnand %p3155_p4, %p4429_p0  ;;  %p3164_p6 = por %p3163_p11, %p3162_p9 }
 0x11b   : > { %p3158_p5 = pneg %p3157_p2 }
 0x11d   : > { %p3165_p3 = pnand %p3164_p6, %p3158_p5 }
 0x11f   : > { %3168 = shalt.err (!%p3165_p3)
}
 0x120   : > { %2700 = dma.hbm_to_vmem [thread:$0]  (!%p4430_p12), %s4350_s15, 1024, %s583_s22, [#allocation24], %s4434_s19, %s4434_s19, %s4433_s14  }
 0x121   : > { %s2378_s26 = sshll.u32 %s3651_s27, 2  ;;  %s3169_s5 = scalar_lea.hbm %s4351_s16, 16 }
 0x122   : > { %p3170_p13 = scmp.ne.s32.totalorder %s4351_s16, %s3169_s5  ;;  %p3176_p10 = scmp.lt.u32.totalorder %s3169_s5, %s4351_s16 }
 0x124   : > { %p3172_p8 = pnand %p3170_p13, %p4429_p0 }
 0x126   : > { %p3173_p7 = pneg %p3172_p8 }
 0x128   : > { %p3178_p1 = pnand %p3176_p10, %p3173_p7 }
 0x12a   : > { %3181 = shalt.err (!%p3178_p1)
}
 0x12b   : > { %s3182_s14 = scalar_lea.vmem %s597_s3, 16  ;;  %s3189_s19 = scalar_lea.vmem %s597_s3, 32 }
 0x12c   : > { %p3183_p4 = scmp.ne.s32.totalorder %s597_s3, %s3182_s14  ;;  %p3190_p9 = scmp.lt.s32.totalorder %s597_s3, %s597_s3 }
 0x12d   : > { %p3191_p11 = scmp.lt.s32.totalorder %s3189_s19, %s3182_s14 }
 0x12e   : > { %p3185_p2 = pnand %p3183_p4, %p4429_p0 }
 0x12f   : > { %p3192_p6 = por %p3191_p11, %p3190_p9 }
 0x130   : > { %p3186_p5 = pneg %p3185_p2 }
 0x132   : > { %p3193_p3 = pnand %p3192_p6, %p3186_p5 }
 0x134   : > { %3196 = shalt.err (!%p3193_p3)
}
 0x135   : > { %2703 = dma.hbm_to_vmem [thread:$0]  (!%p4430_p12), %s4351_s16, 16, %s597_s3, [#allocation27]  }
 0x136   : > { %s2495_s9 = sshll.u32 %s3409_s21, 6  ;;  %s638_s30 = scalar_lea.vmem [#allocation13], %s2378_s26 }
 0x137   : > { %s3875_s23 = scalar_lea.hbm %s4341_s6, %s2495_s9  ;;  %s646_s5 = sshll.u32 %s638_s30, 4  ;;  %s647_s5 = int_to_ptr.vmem [resolvable:$true] %s646_s5 }
 0x138   : > { %s3197_s25 = scalar_lea.hbm %s3875_s23, 64  ;;  %p4435_p13 = scmp.ne.s32.totalorder %s4422_s24, 0 }
 0x139   : > { %p3198_p0 = scmp.ne.s32.totalorder %s3875_s23, %s3197_s25  ;;  %s3202_s21 = scalar_lea.hbm %s4341_s6, 128 }
 0x13a   : > { %p3203_p12 = scmp.lt.u32.totalorder %s3875_s23, %s4341_s6  ;;  %p3204_p10 = scmp.lt.u32.totalorder %s3202_s21, %s3197_s25 }
 0x13b   : > { %p3200_p8 = pnand %p3198_p0, %p4435_p13  ;;  %p3206_p4 = scmp.lt.u32.totalorder %s3197_s25, %s3875_s23 }
 0x13c   : > { %p3205_p1 = por %p3204_p10, %p3203_p12 }
 0x13d   : > { %p3201_p7 = pneg %p3200_p8 }
 0x13e   : > { %p3207_p2 = por %p3206_p4, %p3205_p1 }
 0x140   : > { %p3208_p5 = pnand %p3207_p2, %p3201_p7 }
 0x142   : > { %3211 = shalt.err (!%p3208_p5)
}
 0x143   : > { %s3212_s26 = scalar_lea.vmem %s647_s5, 64  ;;  %s3427_s1 = smov [#allocation13]  }
 0x144   : > { %p3213_p9 = scmp.ne.s32.totalorder %s647_s5, %s3212_s26  ;;  %s3217_s14 = sshll.u32 %s3427_s1, 4  ;;  %s3218_s14 = int_to_ptr.vmem [resolvable:$false] %s3217_s14 }
 0x145   : > { %s3219_s19 = scalar_lea.vmem %s3218_s14, 128  ;;  %p3220_p3 = scmp.lt.s32.totalorder %s647_s5, %s3218_s14 }
 0x146   : > { %p3215_p11 = pnand %p3213_p9, %p4435_p13  ;;  %p3221_p0 = scmp.lt.s32.totalorder %s3219_s19, %s3212_s26 }
 0x148   : > { %p3216_p6 = pneg %p3215_p11  ;;  %p3222_p8 = por %p3221_p0, %p3220_p3 }
 0x14a   : > { %p3223_p10 = pnand %p3222_p8, %p3216_p6 }
 0x14c   : > { %3226 = shalt.err (!%p3223_p10)
}
 0x14d   : > { %p4436_p12 = scmp.ne.s32.totalorder %s4421_s28, 0  ;;  %s4437_s22 = scalar_lea.sflag [#allocation12], %s3645_s0 }
 0x14e   : > { %s3900_s18 = scalar_lea.hbm %s4343_s8, %s3704_s2  ;;  %s677_s17 = scalar_lea.vmem [#allocation16], %s3651_s27 }
 0x14f   : > { %2710 = dma.hbm_to_vmem [thread:$0]  (!%p4436_p12), %s3875_s23, 64, %s647_s5, %s4437_s22  }
 0x150   : > { %s684_s30 = sshll.u32 %s677_s17, 4  ;;  %s3227_s25 = scalar_lea.hbm %s3900_s18, 16  ;;  %s685_s30 = int_to_ptr.vmem [resolvable:$true] %s684_s30 }
 0x151   : > { %p3228_p7 = scmp.ne.s32.totalorder %s3900_s18, %s3227_s25  ;;  %s3232_s23 = scalar_lea.hbm %s4343_s8, 32 }
 0x152   : > { %p3233_p2 = scmp.lt.u32.totalorder %s3900_s18, %s4343_s8  ;;  %p3234_p5 = scmp.lt.u32.totalorder %s3232_s23, %s3227_s25 }
 0x153   : > { %p3230_p1 = pnand %p3228_p7, %p4435_p13  ;;  %p3236_p11 = scmp.lt.u32.totalorder %s3227_s25, %s3900_s18 }
 0x154   : > { %p3235_p9 = por %p3234_p5, %p3233_p2 }
 0x155   : > { %p3231_p4 = pneg %p3230_p1 }
 0x156   : > { %p3237_p6 = por %p3236_p11, %p3235_p9 }
 0x158   : > { %p3238_p3 = pnand %p3237_p6, %p3231_p4 }
 0x15a   : > { %3241 = shalt.err (!%p3238_p3)
}
 0x15b   : > { %s3242_s20 = scalar_lea.vmem %s685_s30, 16  ;;  %s3428_s7 = smov [#allocation16]  }
 0x15c   : > { %p3243_p0 = scmp.ne.s32.totalorder %s685_s30, %s3242_s20  ;;  %s3247_s26 = sshll.u32 %s3428_s7, 4  ;;  %s3248_s26 = int_to_ptr.vmem [resolvable:$false] %s3247_s26 }
 0x15d   : > { %s3249_s1 = scalar_lea.vmem %s3248_s26, 32  ;;  %p3250_p7 = scmp.lt.s32.totalorder %s685_s30, %s3248_s26 }
 0x15e   : > { %p3245_p8 = pnand %p3243_p0, %p4435_p13  ;;  %p3251_p1 = scmp.lt.s32.totalorder %s3249_s1, %s3242_s20 }
 0x160   : > { %p3246_p10 = pneg %p3245_p8  ;;  %p3252_p12 = por %p3251_p1, %p3250_p7 }
 0x162   : > { %p3253_p2 = pnand %p3252_p12, %p3246_p10 }
 0x164   : > { %3256 = shalt.err (!%p3253_p2)
}
 0x165   : > { %p4438_p5 = scmp.ne.s32.totalorder %s4421_s28, 0  ;;  %s4439_s14 = scalar_lea.sflag [#allocation15], %s3645_s0 }
 0x166   : > { %s3926_s13 = scalar_lea.hbm %s4345_s10, %s3704_s2  ;;  %s711_s9 = scalar_lea.vmem [#allocation19], %s3651_s27 }
 0x167   : > { %2716 = dma.hbm_to_vmem [thread:$0]  (!%p4438_p5), %s3900_s18, 16, %s685_s30, %s4439_s14  }
 0x168   : > { %s718_s17 = sshll.u32 %s711_s9, 4  ;;  %s3257_s25 = scalar_lea.hbm %s3926_s13, 16  ;;  %s719_s17 = int_to_ptr.vmem [resolvable:$true] %s718_s17 }
 0x169   : > { %p3258_p12 = scmp.ne.s32.totalorder %s3926_s13, %s3257_s25  ;;  %s3262_s18 = scalar_lea.hbm %s4345_s10, 32 }
 0x16a   : > { %p3263_p11 = scmp.lt.u32.totalorder %s3926_s13, %s4345_s10  ;;  %p3264_p6 = scmp.lt.u32.totalorder %s3262_s18, %s3257_s25 }
 0x16b   : > { %p3260_p4 = pnand %p3258_p12, %p4435_p13  ;;  %p3266_p0 = scmp.lt.u32.totalorder %s3257_s25, %s3926_s13 }
 0x16c   : > { %p3265_p3 = por %p3264_p6, %p3263_p11 }
 0x16d   : > { %p3261_p9 = pneg %p3260_p4 }
 0x16e   : > { %p3267_p8 = por %p3266_p0, %p3265_p3 }
 0x170   : > { %p3268_p10 = pnand %p3267_p8, %p3261_p9 }
 0x172   : > { %3271 = shalt.err (!%p3268_p10)
}
 0x173   : > { %s3272_s5 = scalar_lea.vmem %s719_s17, 16  ;;  %s3429_s21 = smov [#allocation19]  }
 0x174   : > { %p3273_p7 = scmp.ne.s32.totalorder %s719_s17, %s3272_s5  ;;  %s3277_s20 = sshll.u32 %s3429_s21, 4  ;;  %s3278_s20 = int_to_ptr.vmem [resolvable:$false] %s3277_s20 }
 0x175   : > { %s3279_s7 = scalar_lea.vmem %s3278_s20, 32  ;;  %p3280_p12 = scmp.lt.s32.totalorder %s719_s17, %s3278_s20 }
 0x176   : > { %p3275_p1 = pnand %p3273_p7, %p4435_p13  ;;  %p3281_p4 = scmp.lt.s32.totalorder %s3279_s7, %s3272_s5 }
 0x178   : > { %p3276_p2 = pneg %p3275_p1  ;;  %p3282_p5 = por %p3281_p4, %p3280_p12 }
 0x17a   : > { %p3283_p6 = pnand %p3282_p5, %p3276_p2 }
 0x17c   : > { %3286 = shalt.err (!%p3283_p6)
}
 0x17d   : > { %p4440_p11 = scmp.ne.s32.totalorder %s4421_s28, 0  ;;  %s4441_s26 = scalar_lea.sflag [#allocation18], %s3645_s0 }
 0x17e   : > { %s4442_s19 = sld [smem:[#allocation52_spill]]  ;;  %s745_s9 = scalar_lea.vmem [#allocation22], %s3651_s27 }
 0x17f   : > { %2722 = dma.hbm_to_vmem [thread:$0]  (!%p4440_p11), %s3926_s13, 16, %s719_s17, %s4441_s26  }
 0x180   : > { %s752_s25 = sshll.u32 %s745_s9, 4  ;;  %s753_s25 = int_to_ptr.vmem [resolvable:$true] %s752_s25 }
 0x184   : > { %s3952_s22 = scalar_lea.hbm %s4442_s19, %s3704_s2  ;;  %s3292_s13 = scalar_lea.hbm %s4442_s19, 32 }
 0x185   : > { %s3287_s29 = scalar_lea.hbm %s3952_s22, 16  ;;  %p3293_p0 = scmp.lt.u32.totalorder %s3952_s22, %s4442_s19 }
 0x186   : > { %p3288_p5 = scmp.ne.s32.totalorder %s3952_s22, %s3287_s29  ;;  %p3294_p8 = scmp.lt.u32.totalorder %s3292_s13, %s3287_s29 }
 0x187   : > { %p3296_p7 = scmp.lt.u32.totalorder %s3287_s29, %s3952_s22 }
 0x188   : > { %p3290_p9 = pnand %p3288_p5, %p4435_p13  ;;  %p3295_p10 = por %p3294_p8, %p3293_p0 }
 0x18a   : > { %p3291_p3 = pneg %p3290_p9  ;;  %p3297_p1 = por %p3296_p7, %p3295_p10 }
 0x18c   : > { %p3298_p2 = pnand %p3297_p1, %p3291_p3 }
 0x18e   : > { %3301 = shalt.err (!%p3298_p2)
}
 0x18f   : > { %s3302_s2 = scalar_lea.vmem %s753_s25, 16  ;;  %s3430_s27 = smov [#allocation22]  }
 0x190   : > { %p3303_p12 = scmp.ne.s32.totalorder %s753_s25, %s3302_s2  ;;  %s3307_s23 = sshll.u32 %s3430_s27, 4  ;;  %s3308_s23 = int_to_ptr.vmem [resolvable:$false] %s3307_s23 }
 0x191   : > { %s3309_s5 = scalar_lea.vmem %s3308_s23, 32  ;;  %p3310_p5 = scmp.lt.s32.totalorder %s753_s25, %s3308_s23 }
 0x192   : > { %p3305_p4 = pnand %p3303_p12, %p4435_p13  ;;  %p3311_p9 = scmp.lt.s32.totalorder %s3309_s5, %s3302_s2 }
 0x194   : > { %p3306_p6 = pneg %p3305_p4  ;;  %p3312_p11 = por %p3311_p9, %p3310_p5 }
 0x196   : > { %p3313_p0 = pnand %p3312_p11, %p3306_p6 }
 0x198   : > { %3316 = shalt.err (!%p3313_p0)
}
 0x199   : > { %p4443_p8 = scmp.ne.s32.totalorder %s4421_s28, 0  ;;  %s4444_s21 = scalar_lea.sflag [#allocation21], %s3645_s0 }
 0x19a   : > { %s4445_s20 = sld [smem:[#allocation42_spill]] }
 0x19b   : > { %2728 = dma.hbm_to_vmem [thread:$0]  (!%p4443_p8), %s3952_s22, 16, %s753_s25, %s4444_s21  }
 0x1a0   : > { %p4446_p3 = scmp.ne.s32.totalorder %s4445_s20, 0 }
 0x1a1   : > { %s4447_s24 = sld [smem:[#allocation40_spill]] (!%p4446_p3) }
 0x1a2   : > { %761 = sbr.rel (%p4446_p3) target bundleno = 1967 (0x7af), region = 96 }
 0x1a7   : > { %p4448_p13 = scmp.eq.s32.totalorder (!%p4446_p3), %s4447_s24, 0 }
 0x1a9   : > { %3360 = dma.done.wait (%p4448_p13), [#allocation6], 256   ;;  %p4449_p10 = pmov %p4448_p13 }
 0x1ab   : > { %3362 = vsyncadd (%p4449_p10), [#allocation6], 4294967040  ;;  %p4450_p7 = pmov %p4449_p10 }
 0x1ad   : > { %3364 = dma.done.wait (%p4450_p7), [#allocation9], 896   ;;  %p4451_p11 = pmov %p4450_p7 }
 0x1ae   : > { %s4452_s28 = sld [smem:[#allocation38_spill]]  ;;  %s4453_s0 = sld [smem:[#allocation41_spill]] }
 0x1af   : > { %3366 = vsyncadd (%p4451_p11), [#allocation9], 4294966400  ;;  %s775_s7 = sand.u32 1, %s4447_s24  }
 0x1b0   : > { %s776_s14 = scalar_lea.sflag [#allocation12], %s775_s7 }
 0x1b4   : > { %s3986_s26 = sand.u32 1, %s4452_s28   ;;  %p4454_p1 = scmp.ne.s32.totalorder %s4453_s0, 0 }
 0x1b5   : > { %s2393_s1 = sshll.u32 %s3986_s26, 8 }
 0x1b6   : > { %s3989_s22 = scalar_lea.vmem [#allocation11], %s2393_s1 }
 0x1b7   : > { %3368 = dma.done.wait (%p4454_p1), %s776_s14, 4160  }
 0x1b8   : > { %3370 = vsyncadd (%p4454_p1), %s776_s14, 4294963136  ;;  %s2394_s9 = sshll.u32 %s3986_s26, 2  ;;  %s2395_s25 = sshll.u32 %s3986_s26, 6 }
 0x1b9   : > { %s3997_s29 = scalar_lea.vmem [#allocation13], %s2394_s9  ;;  %s794_s3 = scalar_lea.sflag [#allocation15], %s775_s7 }
 0x1ba   : > { %s3999_s18 = scalar_lea.vmem [#allocation14], %s2395_s25 }
 0x1bb   : > { %3372 = dma.done.wait (%p4454_p1), %s794_s3, 1040  }
 0x1bc   : > { %3374 = vsyncadd (%p4454_p1), %s794_s3, 4294966256  ;;  %s805_s13 = scalar_lea.vmem [#allocation16], %s3986_s26  ;;  %s811_s17 = scalar_lea.sflag [#allocation18], %s775_s7 }
 0x1bd   : > { %s813_s30 = scalar_lea.vmem [#allocation17], %s3986_s26 }
 0x1be   : > { %3376 = dma.done.wait (%p4454_p1), %s811_s17, 32  }
 0x1bf   : > { %3378 = vsyncadd (%p4454_p1), %s811_s17, 4294967264  ;;  %s821_s2 = scalar_lea.vmem [#allocation19], %s3986_s26  ;;  %s827_s27 = scalar_lea.sflag [#allocation21], %s775_s7 }
 0x1c0   : > { %s829_s23 = scalar_lea.vmem [#allocation20], %s3986_s26 }
 0x1c1   : > { %3380 = dma.done.wait (%p4454_p1), %s827_s27, 32  }
 0x1c2   : > { %3382 = vsyncadd (%p4454_p1), %s827_s27, 4294967264  ;;  %s837_s5 = scalar_lea.vmem [#allocation22], %s3986_s26  ;;  %p4455_p2 = pmov %p4450_p7 }
 0x1c4   : > { %3384 = dma.done.wait (%p4455_p2), [#allocation24], 1040   ;;  %p4456_p12 = pmov %p4455_p2 }
 0x1c5   : > { %p4457_p4 = pmov %p4455_p2 }
 0x1c6   : > { %3386 = vsyncadd (%p4456_p12), [#allocation24], 4294966256 }
 0x1c7   : > { %3388 = dma.done.wait (%p4457_p4), [#allocation27], 16   ;;  %p4458_p6 = pmov %p4455_p2 }
 0x1c8   : > { %p4459_p5 = scmp.ne.s32.totalorder %s4447_s24, 0 }
 0x1c9   : > { %3390 = vsyncadd (%p4458_p6), [#allocation27], 4294967280  ;;  %v934_v0 = vld [vmem:[#allocation5] sm:$0xff] (!%p4459_p5)  ;;  %v935_v1 = vld [vmem:[#allocation5 + $0x8] sm:$0xff] (!%p4459_p5) }
 0x1ca   : > { %933 = sbr.rel (%p4459_p5) target bundleno = 465 (0x1d1), region = 156  ;;  %v938_v2 = vld [vmem:[#allocation8] sm:$0xff] (!%p4459_p5)  ;;  %936 = vst [vmem:[#allocation2] sm:$0xff] (!%p4459_p5), %v934_v0  ;;  %937 = vst [vmem:[#allocation2 + $0x8] sm:$0xff] (!%p4459_p5), %v935_v1  ;;  %v939_v3 = vld [vmem:[#allocation8 + $0x8] sm:$0xff] (!%p4459_p5) }
 0x1cb   : > { %944 = vst [vmem:[#allocation3] sm:$0xff] (!%p4459_p5), %v938_v2  ;;  %v940_v4 = vld [vmem:[#allocation8 + $0x10] sm:$0xff] (!%p4459_p5)  ;;  %v941_v5 = vld [vmem:[#allocation8 + $0x18] sm:$0xff] (!%p4459_p5)  ;;  %945 = vst [vmem:[#allocation3 + $0x8] sm:$0xff] (!%p4459_p5), %v939_v3 }
 0x1cc   : > { %946 = vst [vmem:[#allocation3 + $0x10] sm:$0xff] (!%p4459_p5), %v940_v4  ;;  %947 = vst [vmem:[#allocation3 + $0x18] sm:$0xff] (!%p4459_p5), %v941_v5  ;;  %v942_v6 = vld [vmem:[#allocation8 + $0x20] sm:$0xff] (!%p4459_p5)  ;;  %v943_v7 = vld [vmem:[#allocation8 + $0x28] sm:$0xff] (!%p4459_p5) }
 0x1cd   : > { %948 = vst [vmem:[#allocation3 + $0x20] sm:$0xff] (!%p4459_p5), %v942_v6  ;;  %949 = vst [vmem:[#allocation3 + $0x28] sm:$0xff] (!%p4459_p5), %v943_v7 }
 0x1d1 PF: > { %v2794_v8 = vld [vmem:[%s3989_s22 + $0x4] ss:$16 sps:$4 sm:$0xff]   ;;  %v2796_v9 = vld [vmem:[%s3989_s22 + $0xc] ss:$16 sps:$4 sm:$0xff]   ;;  %v3431_v10 = vmov 0   ;;  %v3432_v45 = vmov 0.0   ;;  %v993_v62 = vlaneseq }
 0x1d2   : > { %1205 = vmatprep.mubr.bf16.mxu0 %v3431_v10  ;;  %1248 = vmatprep.mubr.bf16.mxu1 %v3431_v10  ;;  %v2798_v11 = vld [vmem:[%s3989_s22] ss:$16 sps:$4 sm:$0xff]   ;;  %v2799_v12 = vld [vmem:[%s3989_s22 + $0x8] ss:$16 sps:$4 sm:$0xff]   ;;  %v2800_v13 = vld [vmem:[%s3989_s22 + $0x24] ss:$16 sps:$4 sm:$0xff]  }
 0x1d3   : > { %1173 = vmatprep.subr.bf16.mxu0 %v2794_v8  ;;  %1216 = vmatprep.subr.bf16.mxu1 %v2796_v9  ;;  %v2802_v14 = vld [vmem:[%s3989_s22 + $0x2c] ss:$16 sps:$4 sm:$0xff]   ;;  %v2804_v15 = vld [vmem:[%s3989_s22 + $0x20] ss:$16 sps:$4 sm:$0xff]   ;;  %v2805_v16 = vld [vmem:[%s3989_s22 + $0x28] ss:$16 sps:$4 sm:$0xff]  }
 0x1d4   : > { %1174 = vmatpush1.bf16.msra.mxu0 %v2798_v11  ;;  %1217 = vmatpush1.bf16.msra.mxu1 %v2799_v12  ;;  %v2806_v17 = vld [vmem:[%s3989_s22 + $0x44] ss:$16 sps:$4 sm:$0xff]   ;;  %v2808_v18 = vld [vmem:[%s3989_s22 + $0x4c] ss:$16 sps:$4 sm:$0xff]   ;;  %v2810_v19 = vld [vmem:[%s3989_s22 + $0x40] ss:$16 sps:$4 sm:$0xff]  }
 0x1d5   : > { %1175 = vmatprep.subr.bf16.mxu0 %v2800_v13  ;;  %1218 = vmatprep.subr.bf16.mxu1 %v2802_v14  ;;  %v2811_v20 = vld [vmem:[%s3989_s22 + $0x48] ss:$16 sps:$4 sm:$0xff]   ;;  %v2812_v21 = vld [vmem:[%s3989_s22 + $0x64] ss:$16 sps:$4 sm:$0xff]   ;;  %v2814_v22 = vld [vmem:[%s3989_s22 + $0x6c] ss:$16 sps:$4 sm:$0xff]  }
 0x1d6   : > { %v2816_v23 = vld [vmem:[%s3989_s22 + $0x60] ss:$16 sps:$4 sm:$0xff]   ;;  %v2817_v24 = vld [vmem:[%s3989_s22 + $0x68] ss:$16 sps:$4 sm:$0xff]   ;;  %v2818_v25 = vld [vmem:[%s3989_s22 + $0x84] ss:$16 sps:$4 sm:$0xff]  }
 0x1d7   : > { %v2820_v26 = vld [vmem:[%s3989_s22 + $0x8c] ss:$16 sps:$4 sm:$0xff]   ;;  %v2822_v27 = vld [vmem:[%s3989_s22 + $0x80] ss:$16 sps:$4 sm:$0xff]   ;;  %v2823_v28 = vld [vmem:[%s3989_s22 + $0x88] ss:$16 sps:$4 sm:$0xff]  }
 0x1d8   : > { %1176 = vmatpush1.bf16.msra.mxu0 %v2804_v15  ;;  %1219 = vmatpush1.bf16.msra.mxu1 %v2805_v16  ;;  %v2824_v29 = vld [vmem:[%s3989_s22 + $0xa4] ss:$16 sps:$4 sm:$0xff]   ;;  %v2826_v30 = vld [vmem:[%s3989_s22 + $0xac] ss:$16 sps:$4 sm:$0xff]   ;;  %v2828_v31 = vld [vmem:[%s3989_s22 + $0xa0] ss:$16 sps:$4 sm:$0xff]  }
 0x1d9   : > { %1177 = vmatprep.subr.bf16.mxu0 %v2806_v17  ;;  %1220 = vmatprep.subr.bf16.mxu1 %v2808_v18  ;;  %v2829_v32 = vld [vmem:[%s3989_s22 + $0xa8] ss:$16 sps:$4 sm:$0xff]   ;;  %v2830_v33 = vld [vmem:[%s3989_s22 + $0xc4] ss:$16 sps:$4 sm:$0xff]   ;;  %v2832_v34 = vld [vmem:[%s3989_s22 + $0xcc] ss:$16 sps:$4 sm:$0xff]  }
 0x1da   : > { %v2834_v35 = vld [vmem:[%s3989_s22 + $0xc0] ss:$16 sps:$4 sm:$0xff]   ;;  %v2835_v36 = vld [vmem:[%s3989_s22 + $0xc8] ss:$16 sps:$4 sm:$0xff]   ;;  %v2836_v37 = vld [vmem:[%s3989_s22 + $0xe4] ss:$16 sps:$4 sm:$0xff]  }
 0x1db   : > { %v2838_v38 = vld [vmem:[%s3989_s22 + $0xec] ss:$16 sps:$4 sm:$0xff]   ;;  %v2840_v39 = vld [vmem:[%s3989_s22 + $0xe0] ss:$16 sps:$4 sm:$0xff]   ;;  %v2841_v40 = vld [vmem:[%s3989_s22 + $0xe8] ss:$16 sps:$4 sm:$0xff]  }
 0x1dc   : > { %1178 = vmatpush1.bf16.msra.mxu0 %v2810_v19  ;;  %1221 = vmatpush1.bf16.msra.mxu1 %v2811_v20  ;;  %v4062_v41 = vld [vmem:[#allocation2] sm:$0xff]  ;;  %v4064_v42 = vld [vmem:[#allocation2 + $0x8] sm:$0xff]  ;;  %v2842_v44 = vld [vmem:[%s3999_s18] sm:$0xff]   ;;  %vm3433_vm0 = vmmov 0   ;;  %v4110_v63 = vshrl.u32 %v993_v62, 7  ;;  %s4460_s24 = sld [smem:[#allocation47_spill]] }
 0x1dd   : > { %1179 = vmatprep.subr.bf16.mxu0 %v2812_v21  ;;  %1222 = vmatprep.subr.bf16.mxu1 %v2814_v22  ;;  %v958_v43 = vpack.c.bf16 %v4064_v42, %v4062_v41  ;;  %v2843_v46 = vld [vmem:[%s3999_s18 + $0x8] sm:$0xff]   ;;  %v2844_v47 = vld [vmem:[%s3999_s18 + $0x10] sm:$0xff]   ;;  %v2846_v48 = vld [vmem:[%s3999_s18 + $0x18] sm:$0xff]   ;;  %vm1413_vm1 = vcmask 130048   ;;  %s4461_s9 = sld [smem:[#allocation48_spill]]  ;;  %vm1653_vm2 = vcmask 392192  }
 0x1de   : > { %v2847_v49 = vld [vmem:[%s3999_s18 + $0x20] sm:$0xff]   ;;  %v2849_v50 = vld [vmem:[%s3999_s18 + $0x28] sm:$0xff]   ;;  %v2850_v51 = vld [vmem:[%s3999_s18 + $0x30] sm:$0xff]   ;;  %v1003_v0 = vsub.s32 2, %v4110_v63  ;;  %v999_v2 = vsub.s32 1, %v4110_v63  ;;  %v1007_v3 = vsub.s32 3, %v4110_v63 }
 0x1df   : > { %v2852_v52 = vld [vmem:[%s3999_s18 + $0x38] sm:$0xff]   ;;  %v4085_v53 = vld [vmem:[#allocation3] sm:$0xff]  ;;  %v4087_v54 = vld [vmem:[#allocation3 + $0x8] sm:$0xff] }
 0x1e0   : > { %1180 = vmatpush1.bf16.msra.mxu0 %v2816_v23  ;;  %1223 = vmatpush1.bf16.msra.mxu1 %v2817_v24  ;;  %v1259_v55 = vpack.c.bf16 %v4087_v54, %v4085_v53  ;;  %v4095_v56 = vld [vmem:[#allocation3 + $0x10] sm:$0xff]  ;;  %v4097_v57 = vld [vmem:[#allocation3 + $0x18] sm:$0xff]  ;;  %v4103_v59 = vld [vmem:[#allocation3 + $0x20] sm:$0xff] }
 0x1e1   : > { %1181 = vmatprep.subr.bf16.mxu0 %v2818_v25  ;;  %1224 = vmatprep.subr.bf16.mxu1 %v2820_v26  ;;  %v1260_v58 = vpack.c.bf16 %v4097_v57, %v4095_v56  ;;  %v4105_v60 = vld [vmem:[#allocation3 + $0x28] sm:$0xff]  ;;  %v4114_v1 = vld [vmem:[%s3997_s29] sm:$0xf]  ;;  %v2432_v62 = vld [vmem:[%s805_s13] ss:$0 sm:$0xff]  ;;  %s4462_s13 = sld [smem:[#allocation40_spill]] }
 0x1e2   : > { %v1261_v61 = vpack.c.bf16 %v4105_v60, %v4103_v59  ;;  %v1004_v4 = vrot.slane %v4114_v1, %v1003_v0  ;;  %v1000_v7 = vrot.slane %v4114_v1, %v999_v2  ;;  %v1008_v8 = vrot.slane %v4114_v1, %v1007_v3  ;;  %v2845_v25 = vld [vmem:[%s4460_s24] sm:$0xff]   ;;  %v2848_v26 = vld [vmem:[%s4460_s24 + $0x8] sm:$0xff]  }
 0x1e4   : > { %1182 = vmatpush1.bf16.msra.mxu0 %v2822_v27  ;;  %1225 = vmatpush1.bf16.msra.mxu1 %v2823_v28  ;;  %v2851_v27 = vld [vmem:[%s4460_s24 + $0x10] sm:$0xff]   ;;  %v2853_v28 = vld [vmem:[%s4461_s9] sm:$0xff]  }
 0x1e5   : > { %1183 = vmatprep.subr.bf16.mxu0 %v2824_v29  ;;  %1226 = vmatprep.subr.bf16.mxu1 %v2826_v30  ;;  %v2855_v29 = vld [vmem:[%s4461_s9 + $0x10] sm:$0xff]  }
 0x1e7   : > { %p2465_p9 = scmp.ne.s32.totalorder %s4462_s13, 1 }
 0x1e8   : > { %1184 = vmatpush1.bf16.msra.mxu0 %v2828_v31  ;;  %1227 = vmatpush1.bf16.msra.mxu1 %v2829_v32  ;;  %s4463_s26 = sld [smem:[#allocation53_spill]] (!%p2465_p9)  ;;  %vm3435_vm3 = vmmov (!%p2465_p9), 0   ;;  %s4464_s13 = sld [smem:[#allocation55_spill]] (!%p2465_p9) }
 0x1e9   : > { %1185 = vmatprep.subr.bf16.mxu0 %v2830_v33  ;;  %1228 = vmatprep.subr.bf16.mxu1 %v2832_v34  ;;  %s4465_s3 = sld [smem:[#allocation56_spill]] (!%p2465_p9) }
 0x1ec   : > { %1186 = vmatpush1.bf16.msra.mxu0 %v2834_v35  ;;  %1229 = vmatpush1.bf16.msra.mxu1 %v2835_v36 }
 0x1ed   : > { %1187 = vmatprep.subr.bf16.mxu0 %v2836_v37  ;;  %1230 = vmatprep.subr.bf16.mxu1 %v2838_v38 }
 0x1f0   : > { %1188 = vmatpush1.bf16.msra.mxu0 %v2840_v39  ;;  %1231 = vmatpush1.bf16.msra.mxu1 %v2841_v40 }
 0x1f1   : > { %2539 = vmatprep.subr.bf16.mxu0 %v3432_v45 }
 0x1f3   : > { %1206 = vmatmul.mubr.bf16.vlgmr.msra.gmra.mrb[0].mxu0 %v958_v43  ;;  %1249 = vmatmul.mubr.bf16.vlgmr.msra.gmra.mrb[0].mxu1 %v958_v43 }
 0x1f4   : > { %1455 = vmatprep.mubr.bf16.mxu1 %v3431_v10  ;;  %2540 = vmatpush3.bf16.msra.mxu0 %v2842_v44 }
 0x1f5   : > { %2541 = vmatprep.subr.bf16.mxu0 %v3432_v45  ;;  %2555 = vmatprep.mubr.msk.bf16.mxu0 %vm3433_vm0, %v3432_v45 }
 0x1f8   : > { %2542 = vmatpush3.bf16.msra.mxu0 %v2843_v46 }
 0x1f9   : > { %2543 = vmatprep.subr.bf16.mxu0 %v3432_v45 }
 0x1fc   : > { %2544 = vmatpush3.bf16.msra.mxu0 %v2844_v47 }
 0x1fd   : > { %2545 = vmatprep.subr.bf16.mxu0 %v3432_v45 }
 0x200   : > { %2546 = vmatpush3.bf16.msra.mxu0 %v2846_v48 }
 0x201   : > { %2547 = vmatprep.subr.bf16.mxu0 %v3432_v45 }
 0x204   : > { %2548 = vmatpush3.bf16.msra.mxu0 %v2847_v49 }
 0x205   : > { %2549 = vmatprep.subr.bf16.mxu0 %v3432_v45 }
 0x208   : > { %2550 = vmatpush3.bf16.msra.mxu0 %v2849_v50 }
 0x209   : > { %2551 = vmatprep.subr.bf16.mxu0 %v3432_v45 }
 0x20c   : > { %2552 = vmatpush3.bf16.msra.mxu0 %v2850_v51 }
 0x20d   : > { %2553 = vmatprep.subr.bf16.mxu0 %v3432_v45 }
 0x210   : > { %2554 = vmatpush3.bf16.msra.mxu0 %v2852_v52 }
 0x213   : > { %2556 = vmatmul.mubr.bf16.vlgmr.msra.gmra.mrb[4].mxu0 %v1259_v55 }
 0x214   : > { %2559 = vmatprep.mubr.msk.bf16.mxu0 %vm3433_vm0, %v3432_v45 }
 0x21b   : > { %2560 = vmatmul.mubr.bf16.gmra.mrb[8].mxu0 %v1260_v58 }
 0x21c   : > { %2563 = vmatprep.mubr.msk.bf16.mxu0 %vm3433_vm0, %v3432_v45 }
 0x223   : > { %2564 = vmatmul.mubr.bf16.gmra.mrb[12].mxu0 %v1261_v61 }
 0x224   : > { %1689 = vmatprep.mubr.bf16.mxu0 %v3431_v10 }
 0x2c6   : > { %v4119_v5 = vpop.f32.mrb[0].mxu0  ;;  %v1250_v6 = vpop.f32.mrb[0].mxu1 }
 0x2c7   : > { %v1209_v9 = vpop.f32.mrb[1].mxu0  ;;  %v1252_v11 = vpop.f32.mrb[1].mxu1  ;;  %v1251_v14 = vadd.f32 %v1250_v6, %v1004_v4  ;;  %v4176_v6 = vld [vmem:[%s829_s23] ss:$0 sm:$0xff] }
 0x2c8   : > { %v4123_v12 = vpop.f32.mrb[2].mxu0  ;;  %v1254_v13 = vpop.f32.mrb[2].mxu1  ;;  %v1210_v18 = vadd.f32 %v1209_v9, %v1000_v7  ;;  %v1253_v19 = vadd.f32 %v1252_v11, %v1008_v8 }
 0x2c9   : > { %v1255_v15 = vadd.f32 %v1254_v13, %v1004_v4  ;;  %v1213_v16 = vpop.f32.mrb[3].mxu0  ;;  %v1256_v17 = vpop.f32.mrb[3].mxu1 }
 0x2ca   : > { %v1214_v20 = vadd.f32 %v1213_v16, %v1000_v7  ;;  %v1257_v21 = vadd.f32 %v1256_v17, %v1008_v8 }
 0x2cb   : > { %v1397_v22 = vpack.c.bf16 %v1255_v15, %v1251_v14  ;;  %v4180_v14 = vld [vmem:[%s837_s5] ss:$0 sm:$0xff] }
 0x2cc   : > { %v1396_v23 = vpack.c.bf16 %v1214_v20, %v1210_v18  ;;  %v1492_v24 = vpack.c.bf16 %v1257_v21, %v1253_v19 }
 0x2cd   : > { %1423 = vmatprep.subr.bf16.mxu1 %v1397_v22 }
 0x2ce   : > { %1424 = vmatpush1.bf16.msra.mxu1 %v1396_v23 }
 0x2cf   : > { %2567 = vmatprep.subr.bf16.mxu1 %v3432_v45 }
 0x2d1   : > { %2444 = vmatmul.mubr.msk.bf16.vlgmr.msra.gmra.mrb[4].mxu1 %vm1413_vm1, %v2845_v25 }
 0x2d2   : > { %2568 = vmatpush3.bf16.msra.mxu1 %v1492_v24  ;;  %1465 = vmatprep.mubr.bf16.mxu1 %v3431_v10 }
 0x2d9   : > { %2445 = vmatmul.mubr.msk.bf16.gmra.mrb[8].mxu1 %vm1413_vm1, %v2848_v26 }
 0x2da   : > { %1475 = vmatprep.mubr.bf16.mxu1 %v3431_v10  ;;  %v2854_v10 = vld [vmem:[%s4461_s9 + $0x8] sm:$0xff]  }
 0x2e1   : > { %2446 = vmatmul.mubr.msk.bf16.gmra.mrb[12].mxu1 %vm1413_vm1, %v2851_v27 }
 0x2e2   : > { %2569 = vmatprep.mubr.msk.bf16.mxu1 %vm3433_vm0, %v3432_v45 }
 0x2e6   : > { %v1367_v30 = vpop.f32.mrb[4].mxu0 }
 0x2e7   : > { %v2557_v31 = vpop.f32.mrb[5].mxu0  ;;  %v1368_v0 = vadd.f32 %v2432_v62, %v1367_v30 }
 0x2e8   : > { %v1370_v32 = vpop.f32.mrb[6].mxu0 }
 0x2e9   : > { %2570 = vmatmul.mubr.msk.bf16.vlgmr.msra.gmra.mrb[16].mxu1 %vm1413_vm1, %v2853_v28  ;;  %v2558_v33 = vpop.f32.mrb[7].mxu0  ;;  %v1371_v8 = vadd.f32 %v2432_v62, %v1370_v32 }
 0x2ea   : > { %2573 = vmatprep.mubr.msk.bf16.mxu1 %vm3433_vm0, %v3432_v45 }
 0x2ee   : > { %v1375_v34 = vpop.f32.mrb[8].mxu0 }
 0x2ef   : > { %v2561_v35 = vpop.f32.mrb[9].mxu0  ;;  %v1376_v18 = vadd.f32 %v2432_v62, %v1375_v34 }
 0x2f0   : > { %v1378_v36 = vpop.f32.mrb[10].mxu0 }
 0x2f1   : > { %2574 = vmatmul.mubr.msk.bf16.gmra.mrb[20].mxu1 %vm1413_vm1, %v2854_v10  ;;  %v2562_v37 = vpop.f32.mrb[11].mxu0  ;;  %v1379_v27 = vadd.f32 %v2432_v62, %v1378_v36 }
 0x2f2   : > { %2577 = vmatprep.mubr.msk.bf16.mxu1 %vm3433_vm0, %v3432_v45 }
 0x2f6   : > { %v1383_v38 = vpop.f32.mrb[12].mxu0 }
 0x2f7   : > { %v2565_v39 = vpop.f32.mrb[13].mxu0 }
 0x2f8   : > { %v4158_v40 = vpop.f32.mrb[14].mxu0  ;;  %v1384_v39 = vadd.f32 %v2432_v62, %v1383_v38 }
 0x2f9   : > { %2578 = vmatmul.mubr.msk.bf16.gmra.mrb[24].mxu1 %vm1413_vm1, %v2855_v29  ;;  %v2566_v43 = vpop.f32.mrb[15].mxu0 }
 0x3a4   : > { %v4160_v44 = vpop.f32.mrb[4].mxu1 }
 0x3a5   : > { %v1459_v45 = vpop.f32.mrb[5].mxu1 }
 0x3a6   : > { %v4162_v46 = vpop.f32.mrb[6].mxu1 }
 0x3a7   : > { %v1463_v47 = vpop.f32.mrb[7].mxu1 }
 0x3ac   : > { %v4164_v48 = vpop.f32.mrb[8].mxu1 }
 0x3ad   : > { %v1469_v49 = vpop.f32.mrb[9].mxu1 }
 0x3ae   : > { %v4166_v50 = vpop.f32.mrb[10].mxu1 }
 0x3af   : > { %v1473_v51 = vpop.f32.mrb[11].mxu1 }
 0x3b4   : > { %v4168_v52 = vpop.f32.mrb[12].mxu1 }
 0x3b5   : > { %v1479_v55 = vpop.f32.mrb[13].mxu1 }
 0x3b6   : > { %v4170_v58 = vpop.f32.mrb[14].mxu1 }
 0x3b7   : > { %v1483_v61 = vpop.f32.mrb[15].mxu1 }
 0x3bc   : > { %v1551_v2 = vpop.f32.mrb[16].mxu1 }
 0x3bd   : > { %v1574_v3 = vadd.f32 %v1551_v2, %v1459_v45  ;;  %v2571_v4 = vpop.f32.mrb[17].mxu1 }
 0x3be   : > { %v1554_v7 = vpop.f32.mrb[18].mxu1 }
 0x3bf   : > { %v1580_v9 = vadd.f32 %v1574_v3, %v1368_v0  ;;  %v1575_v11 = vadd.f32 %v1554_v7, %v1463_v47  ;;  %v2572_v13 = vpop.f32.mrb[19].mxu1  ;;  %v1387_v3 = vadd.f32 %v2432_v62, %v4158_v40 }
 0x3c1   : > { %v2453_v15 = vmul.f32 -1.442695, %v1580_v9  ;;  %v1739_v16 = vmul.f32 %v4176_v6, %v1580_v9  ;;  %v1581_v17 = vadd.f32 %v1575_v11, %v1371_v8 }
 0x3c3   : > { %2857 = vpow2.f32 %v2453_v15  ;;  %v1752_v19 = vadd.f32 %v4180_v14, %v1739_v16  ;;  %v2454_v20 = vmul.f32 -1.442695, %v1581_v17  ;;  %v1740_v21 = vmul.f32 %v4176_v6, %v1581_v17 }
 0x3c4   : > { %v1559_v22 = vpop.f32.mrb[20].mxu1 }
 0x3c5   : > { %v1760_v23 = vmax.f32 %v1752_v19, 0.0  ;;  %2859 = vpow2.f32 %v2454_v20  ;;  %v1753_v24 = vadd.f32 %v4180_v14, %v1740_v21  ;;  %v1576_v25 = vadd.f32 %v1559_v22, %v1469_v49  ;;  %v2575_v26 = vpop.f32.mrb[21].mxu1 }
 0x3c6   : > { %v1562_v28 = vpop.f32.mrb[22].mxu1 }
 0x3c7   : > { %v1768_v10 = vadd.f32 %v1760_v23, %v4085_v53  ;;  %v1761_v29 = vmax.f32 %v1753_v24, 0.0  ;;  %v1582_v30 = vadd.f32 %v1576_v25, %v1376_v18  ;;  %v1577_v31 = vadd.f32 %v1562_v28, %v1473_v51  ;;  %v2576_v32 = vpop.f32.mrb[23].mxu1 }
 0x3c9   : > { %1776 = vst [vmem:[#allocation3] sm:$0xff] %v1768_v10  ;;  %v1769_v33 = vadd.f32 %v1761_v29, %v4087_v54  ;;  %v2455_v34 = vmul.f32 -1.442695, %v1582_v30  ;;  %v1741_v35 = vmul.f32 %v4176_v6, %v1582_v30  ;;  %v1583_v37 = vadd.f32 %v1577_v31, %v1379_v27 }
 0x3cb   : > { %1777 = vst [vmem:[#allocation3 + $0x8] sm:$0xff] %v1769_v33  ;;  %2861 = vpow2.f32 %v2455_v34  ;;  %v1754_v43 = vadd.f32 %v4180_v14, %v1741_v35  ;;  %v2456_v36 = vmul.f32 -1.442695, %v1583_v37  ;;  %v1742_v45 = vmul.f32 %v4176_v6, %v1583_v37 }
 0x3cc   : > { %v1567_v53 = vpop.f32.mrb[24].mxu1 }
 0x3cd   : > { %v2858_v47 = vpop.eup %2857  ;;  %v1762_v49 = vmax.f32 %v1754_v43, 0.0  ;;  %2863 = vpow2.f32 %v2456_v36  ;;  %v1755_v51 = vadd.f32 %v4180_v14, %v1742_v45  ;;  %v1578_v0 = vadd.f32 %v1567_v53, %v1479_v55  ;;  %v2579_v54 = vpop.f32.mrb[25].mxu1  ;;  %v2856_v53 = vld [vmem:[#allocation10] sm:$0xff]  }
 0x3ce   : > { %v1604_v2 = vadd.f32 1.0, %v2858_v47  ;;  %v1570_v4 = vpop.f32.mrb[26].mxu1 }
 0x3cf   : > { %v2860_v38 = vpop.eup %2859  ;;  %v1770_v7 = vadd.f32 %v1762_v49, %v4095_v56  ;;  %v1763_v8 = vmax.f32 %v1755_v51, 0.0  ;;  %v1584_v9 = vadd.f32 %v1578_v0, %v1384_v39  ;;  %v1579_v11 = vadd.f32 %v1570_v4, %v1483_v61  ;;  %v2580_v13 = vpop.f32.mrb[27].mxu1 }
 0x3d0   : > { %2865 = vrcp.f32 %v1604_v2  ;;  %v1605_v15 = vadd.f32 1.0, %v2860_v38 }
 0x3d1   : > { %1778 = vst [vmem:[#allocation3 + $0x10] sm:$0xff] %v1770_v7  ;;  %v1771_v16 = vadd.f32 %v1763_v8, %v4097_v57  ;;  %v2457_v17 = vmul.f32 -1.442695, %v1584_v9  ;;  %v1743_v55 = vmul.f32 %v4176_v6, %v1584_v9  ;;  %v1585_v18 = vadd.f32 %v1579_v11, %v1387_v3 }
 0x3d2   : > { %2867 = vrcp.f32 %v1605_v15  ;;  %v2461_v15 = vld [vmem:[%s813_s30] ss:$0 sm:$0xff] }
 0x3d3   : > { %1779 = vst [vmem:[#allocation3 + $0x18] sm:$0xff] %v1771_v16  ;;  %2869 = vpow2.f32 %v2457_v17  ;;  %v1756_v40 = vadd.f32 %v4180_v14, %v1743_v55  ;;  %v2458_v62 = vmul.f32 -1.442695, %v1585_v18  ;;  %v1744_v56 = vmul.f32 %v4176_v6, %v1585_v18  ;;  %v2462_v55 = vld [vmem:[%s821_s2] ss:$0 sm:$0xff] }
 0x3d5   : > { %v2862_v19 = vpop.eup %2861  ;;  %v1764_v61 = vmax.f32 %v1756_v40, 0.0  ;;  %2871 = vpow2.f32 %v2458_v62  ;;  %v1757_v20 = vadd.f32 %v4180_v14, %v1744_v56 }
 0x3d6   : > { %v1606_v21 = vadd.f32 1.0, %v2862_v19 }
 0x3d7   : > { %v2864_v22 = vpop.eup %2863  ;;  %v1772_v57 = vadd.f32 %v1764_v61, %v4103_v59  ;;  %v1765_v23 = vmax.f32 %v1757_v20, 0.0 }
 0x3d8   : > { %2873 = vrcp.f32 %v1606_v21  ;;  %v1607_v24 = vadd.f32 1.0, %v2864_v22  ;;  %v3434_v22 = vmov (!%p2465_p9), 0.0  }
 0x3d9   : > { %1780 = vst [vmem:[#allocation3 + $0x20] sm:$0xff] %v1772_v57  ;;  %v1773_v25 = vadd.f32 %v1765_v23, %v4105_v60  ;;  %2601 = vmatprep.subr.bf16.mxu1 (!%p2465_p9), %v3434_v22  ;;  %2617 = vmatprep.mubr.msk.bf16.mxu1 (!%p2465_p9), %vm3435_vm3, %v3434_v22  ;;  %v2887_v23 = vld [vmem:[%s4463_s26 + $0x10] sm:$0xff] (!%p2465_p9)  }
 0x3da   : > { %v2866_v26 = vpop.eup %2865  ;;  %2875 = vrcp.f32 %v1607_v24 }
 0x3db   : > { %1781 = vst [vmem:[#allocation3 + $0x28] sm:$0xff] %v1773_v25  ;;  %v1622_v6 = vmul.f32 %v2866_v26, %v4160_v44  ;;  %v2893_v25 = vld [vmem:[#allocation25] sm:$0xff] (!%p2465_p9)  }
 0x3dc   : > { %v2868_v27 = vpop.eup %2867  ;;  %2602 = vmatpush3.bf16.msra.mxu1 (!%p2465_p9), %v2893_v25 }
 0x3dd   : > { %v2870_v28 = vpop.eup %2869  ;;  %v1634_v10 = vpack.c.bf16 %v2868_v27, %v2866_v26  ;;  %v1623_v14 = vmul.f32 %v2868_v27, %v4162_v46  ;;  %v2888_v26 = vld [vmem:[%s4463_s26 + $0x18] sm:$0xff] (!%p2465_p9)   ;;  %v2894_v27 = vld [vmem:[#allocation25 + $0x8] sm:$0xff] (!%p2465_p9)   ;;  %2603 = vmatprep.subr.bf16.mxu1 (!%p2465_p9), %v3434_v22 }
 0x3de   : > { %v1608_v29 = vadd.f32 1.0, %v2870_v28  ;;  %v2889_v28 = vld [vmem:[%s4463_s26 + $0x20] sm:$0xff] (!%p2465_p9)  }
 0x3df   : > { %v2872_v30 = vpop.eup %2871  ;;  %1657 = vmatprep.subr.bf16.mxu0 %v1634_v10  ;;  %v1628_v59 = vpack.c.bf16 %v1623_v14, %v1622_v6  ;;  %v2895_v14 = vld [vmem:[#allocation25 + $0x10] sm:$0xff] (!%p2465_p9)  }
 0x3e0   : > { %2877 = vrcp.f32 %v1608_v29  ;;  %v1609_v31 = vadd.f32 1.0, %v2872_v30  ;;  %2604 = vmatpush3.bf16.msra.mxu1 (!%p2465_p9), %v2894_v27  ;;  %v2890_v29 = vld [vmem:[%s4463_s26 + $0x28] sm:$0xff] (!%p2465_p9)   ;;  %v2896_v30 = vld [vmem:[#allocation25 + $0x18] sm:$0xff] (!%p2465_p9)  }
 0x3e1   : > { %1658 = vmatpush1.bf16.msra.mxu0 %v1628_v59  ;;  %2605 = vmatprep.subr.bf16.mxu1 (!%p2465_p9), %v3434_v22 }
 0x3e2   : > { %v2874_v32 = vpop.eup %2873  ;;  %2879 = vrcp.f32 %v1609_v31  ;;  %v2891_v31 = vld [vmem:[%s4463_s26 + $0x30] sm:$0xff] (!%p2465_p9)  }
 0x3e3   : > { %v1624_v60 = vmul.f32 %v2874_v32, %v4164_v48 }
 0x3e4   : > { %v2876_v33 = vpop.eup %2875  ;;  %2606 = vmatpush3.bf16.msra.mxu1 (!%p2465_p9), %v2895_v14 }
 0x3e5   : > { %v1635_v34 = vpack.c.bf16 %v2876_v33, %v2874_v32  ;;  %v1625_v44 = vmul.f32 %v2876_v33, %v4166_v50  ;;  %2607 = vmatprep.subr.bf16.mxu1 (!%p2465_p9), %v3434_v22  ;;  %v2897_v32 = vld [vmem:[#allocation25 + $0x20] sm:$0xff] (!%p2465_p9)  }
 0x3e6   : > { %v2892_v33 = vld [vmem:[%s4463_s26 + $0x38] sm:$0xff] (!%p2465_p9)  }
 0x3e7   : > { %1659 = vmatprep.subr.bf16.mxu0 %v1635_v34  ;;  %v1629_v35 = vpack.c.bf16 %v1625_v44, %v1624_v60  ;;  %v2898_v34 = vld [vmem:[#allocation25 + $0x28] sm:$0xff] (!%p2465_p9)  }
 0x3e8   : > { %2608 = vmatpush3.bf16.msra.mxu1 (!%p2465_p9), %v2896_v30 }
 0x3e9   : > { %1660 = vmatpush1.bf16.msra.mxu0 %v1629_v35  ;;  %2609 = vmatprep.subr.bf16.mxu1 (!%p2465_p9), %v3434_v22  ;;  %v2899_v35 = vld [vmem:[#allocation25 + $0x30] sm:$0xff] (!%p2465_p9)  }
 0x3ea   : > { %v2878_v37 = vpop.eup %2877 }
 0x3eb   : > { %v1626_v46 = vmul.f32 %v2878_v37, %v4168_v52  ;;  %v995_v52 = vsub.s32 0, %v4110_v63 }
 0x3ec   : > { %v2880_v39 = vpop.eup %2879  ;;  %2610 = vmatpush3.bf16.msra.mxu1 (!%p2465_p9), %v2897_v32 }
 0x3ed   : > { %v1636_v43 = vpack.c.bf16 %v2880_v39, %v2878_v37  ;;  %v1627_v36 = vmul.f32 %v2880_v39, %v4170_v58  ;;  %v996_v3 = vrot.slane %v4114_v1, %v995_v52  ;;  %2611 = vmatprep.subr.bf16.mxu1 (!%p2465_p9), %v3434_v22  ;;  %v2900_v37 = vld [vmem:[#allocation25 + $0x38] sm:$0xff] (!%p2465_p9)   ;;  %v2902_v39 = vld [vmem:[%s4464_s13 + $0x8] sm:$0xff] (!%p2465_p9)  }
 0x3ef   : > { %1661 = vmatprep.subr.bf16.mxu0 %v1636_v43  ;;  %v1630_v45 = vpack.c.bf16 %v1627_v36, %v1626_v46  ;;  %v1208_v9 = vadd.f32 %v4119_v5, %v996_v3  ;;  %v1212_v16 = vadd.f32 %v4123_v12, %v996_v3  ;;  %v2885_v12 = vld [vmem:[%s4463_s26] sm:$0xff] (!%p2465_p9)   ;;  %v2903_v43 = vld [vmem:[%s4464_s13 + $0x10] sm:$0xff] (!%p2465_p9)   ;;  %v2904_v36 = vld [vmem:[%s4464_s13 + $0x18] sm:$0xff] (!%p2465_p9)  }
 0x3f0   : > { %2612 = vmatpush3.bf16.msra.mxu1 (!%p2465_p9), %v2898_v34  ;;  %v2901_v46 = vld [vmem:[%s4464_s13] sm:$0xff] (!%p2465_p9)   ;;  %v1918_v3 = vld [vmem:[#allocation26] sm:$0x1] (!%p2465_p9) }
 0x3f1   : > { %1662 = vmatpush1.bf16.msra.mxu0 %v1630_v45  ;;  %2613 = vmatprep.subr.bf16.mxu1 (!%p2465_p9), %v3434_v22  ;;  %v2905_v45 = vld [vmem:[%s4464_s13 + $0x20] sm:$0xff] (!%p2465_p9)  }
 0x3f2   : > { %2581 = vmatprep.subr.bf16.mxu0 (!%p2465_p9), %v3434_v22 }
 0x3f4   : > { %2460 = vmatmul.mubr.msk.bf16.vlgmr.msra.gmra.mrb[16].mxu0 %vm1653_vm2, %v2856_v53  ;;  %2614 = vmatpush3.bf16.msra.mxu1 (!%p2465_p9), %v2899_v35  ;;  %v2906_v53 = vld [vmem:[%s4464_s13 + $0x28] sm:$0xff] (!%p2465_p9)  }
 0x3f5   : > { %2582 = vmatpush3.bf16.msra.mxu0 (!%p2465_p9), %v2885_v12  ;;  %2597 = vmatprep.mubr.msk.bf16.mxu0 (!%p2465_p9), %vm3435_vm3, %v3434_v22 }
 0x3f6   : > { %2583 = vmatprep.subr.bf16.mxu0 (!%p2465_p9), %v3434_v22  ;;  %2615 = vmatprep.subr.bf16.mxu1 (!%p2465_p9), %v3434_v22 }
 0x3f8   : > { %2616 = vmatpush3.bf16.msra.mxu1 (!%p2465_p9), %v2900_v37 }
 0x4c7   : > { %v1691_v48 = vpop.f32.mrb[16].mxu0 }
 0x4c8   : > { %v1693_v47 = vpop.f32.mrb[17].mxu0 }
 0x4c9   : > { %v1700_v49 = vadd.f32 1e-06, %v1693_v47  ;;  %v1695_v50 = vpop.f32.mrb[18].mxu0 }
 0x4ca   : > { %v1697_v51 = vpop.f32.mrb[19].mxu0 }
 0x4cb   : > { %2881 = vrcp.f32 %v1700_v49  ;;  %v1701_v0 = vadd.f32 1e-06, %v1697_v51 }
 0x4cd   : > { %2883 = vrcp.f32 %v1701_v0 }
 0x4d5   : > { %v2882_v54 = vpop.eup %2881 }
 0x4d6   : > { %v1704_v58 = vmul.f32 %v2882_v54, %v1700_v49 }
 0x4d7   : > { %v2884_v2 = vpop.eup %2883 }
 0x4d8   : > { %v1706_v4 = vsub.f32 2.0, %v1704_v58  ;;  %v1705_v38 = vmul.f32 %v2884_v2, %v1701_v0  ;;  %v2907_v58 = vld [vmem:[%s4464_s13 + $0x30] sm:$0xff] (!%p2465_p9)  }
 0x4da   : > { %v1708_v7 = vmul.f32 %v2882_v54, %v1706_v4  ;;  %v1707_v8 = vsub.f32 2.0, %v1705_v38 }
 0x4dc   : > { %v1710_v11 = vmul.f32 %v1708_v7, %v1691_v48  ;;  %v1709_v13 = vmul.f32 %v2884_v2, %v1707_v8  ;;  %v1811_v48 = vld [vmem:[#allocation23] sm:$0x1] (!%p2465_p9) }
 0x4dd   : > { %v2908_v2 = vld [vmem:[%s4464_s13 + $0x38] sm:$0xff] (!%p2465_p9)  }
 0x4de   : > { %v1712_v17 = vadd.f32 %v1710_v11, %v1208_v9  ;;  %v1711_v63 = vmul.f32 %v1709_v13, %v1695_v50 }
 0x4e0   : > { %v1721_v18 = vmul.f32 %v2461_v15, %v1712_v17  ;;  %v1713_v40 = vadd.f32 %v1711_v63, %v1212_v16 }
 0x4e2   : > { %v1730_v62 = vadd.f32 %v2462_v55, %v1721_v18  ;;  %v1722_v1 = vmul.f32 %v2461_v15, %v1713_v40  ;;  %v2025_v15 = vld [vmem:[%s4465_s3] sm:$0x1] (!%p2465_p9) }
 0x4e4   : > { %v1758_v56 = vmax.f32 %v1730_v62, 0.0  ;;  %v1731_v19 = vadd.f32 %v2462_v55, %v1722_v1  ;;  %1785 = sbr.rel (%p2465_p9) target bundleno = 1933 (0x78d), region = 160 }
 0x4e6   : > { %v1766_v61 = vadd.f32 %v1758_v56, %v4062_v41  ;;  %v1759_v20 = vmax.f32 %v1731_v19, 0.0  ;;  %v2886_v41 = vld [vmem:[%s4463_s26 + $0x8] sm:$0xff] (!%p2465_p9)  }
 0x4e7   : > { %2584 = vmatpush3.bf16.msra.mxu0 (!%p2465_p9), %v2886_v41 }
 0x4e8   : > { %1774 = vst [vmem:[#allocation2] sm:$0xff] %v1766_v61  ;;  %v1767_v5 = vadd.f32 %v1759_v20, %v4064_v42  ;;  %2585 = vmatprep.subr.bf16.mxu0 (!%p2465_p9), %v3434_v22 }
 0x4ea   : > { %1775 = vst [vmem:[#allocation2 + $0x8] sm:$0xff] %v1767_v5  ;;  %v1786_v21 = vadd.f32 (!%p2465_p9), %v1767_v5, %v1766_v61 }
 0x4eb   : > { %2586 = vmatpush3.bf16.msra.mxu0 %v2887_v23 }
 0x4ec   : > { %v1787_v42 = vrot.slane %v1786_v21, 4  ;;  %2587 = vmatprep.subr.bf16.mxu0 %v3434_v22 }
 0x4ee   : > { %v1788_v57 = vadd.f32 %v1787_v42, %v1786_v21 }
 0x4ef   : > { %2588 = vmatpush3.bf16.msra.mxu0 %v2888_v26 }
 0x4f0   : > { %v1789_v24 = vrot.slane %v1788_v57, 2  ;;  %2589 = vmatprep.subr.bf16.mxu0 %v3434_v22 }
 0x4f2   : > { %v1790_v6 = vadd.f32 %v1789_v24, %v1788_v57 }
 0x4f3   : > { %2590 = vmatpush3.bf16.msra.mxu0 %v2889_v28 }
 0x4f4   : > { %v1791_v10 = vrot.slane %v1790_v6, 1  ;;  %2591 = vmatprep.subr.bf16.mxu0 %v3434_v22 }
 0x4f6   : > { %v1792_v59 = vadd.f32 %v1791_v10, %v1790_v6 }
 0x4f7   : > { %2592 = vmatpush3.bf16.msra.mxu0 %v2890_v29 }
 0x4f8   : > { %2593 = vmatprep.subr.bf16.mxu0 %v3434_v22  ;;  %v1793_v60 = vmul.f32 0.0625, %v1792_v59 }
 0x4fa   : > { %v1794_v44 = vpack.c.bf16 %v1793_v60, %v1793_v60 }
 0x4fb   : > { %2594 = vmatpush3.bf16.msra.mxu0 %v2891_v31 }
 0x4fc   : > { %2595 = vmatprep.subr.bf16.mxu0 %v3434_v22 }
 0x4ff   : > { %2596 = vmatpush3.bf16.msra.mxu0 %v2892_v33 }
 0x500   : > { %2621 = vmatprep.subr.bf16.mxu0 %v3434_v22 }
 0x502   : > { %2598 = vmatmul.mubr.bf16.vlgmr.msra.gmra.mrb[0].mxu0 %v1794_v44 }
 0x503   : > { %2637 = vmatprep.mubr.msk.bf16.mxu0 %vm3435_vm3, %v3434_v22  ;;  %2622 = vmatpush3.bf16.msra.mxu0 %v2901_v46 }
 0x504   : > { %2623 = vmatprep.subr.bf16.mxu0 %v3434_v22 }
 0x507   : > { %2624 = vmatpush3.bf16.msra.mxu0 %v2902_v39 }
 0x508   : > { %2625 = vmatprep.subr.bf16.mxu0 %v3434_v22 }
 0x50b   : > { %2626 = vmatpush3.bf16.msra.mxu0 %v2903_v43 }
 0x50c   : > { %2627 = vmatprep.subr.bf16.mxu0 %v3434_v22 }
 0x50f   : > { %2628 = vmatpush3.bf16.msra.mxu0 %v2904_v36 }
 0x510   : > { %2629 = vmatprep.subr.bf16.mxu0 %v3434_v22 }
 0x513   : > { %2630 = vmatpush3.bf16.msra.mxu0 %v2905_v45 }
 0x514   : > { %2631 = vmatprep.subr.bf16.mxu0 %v3434_v22 }
 0x517   : > { %2632 = vmatpush3.bf16.msra.mxu0 %v2906_v53 }
 0x518   : > { %2633 = vmatprep.subr.bf16.mxu0 %v3434_v22 }
 0x51b   : > { %2634 = vmatpush3.bf16.msra.mxu0 %v2907_v58 }
 0x51c   : > { %2635 = vmatprep.subr.bf16.mxu0 %v3434_v22 }
 0x51f   : > { %2636 = vmatpush3.bf16.msra.mxu0 %v2908_v2 }
 0x5d5   : > { %v1894_v47 = vpop.f32.mrb[0].mxu0 }
 0x5d6   : > { %v1895_v49 = vadd.f32 %v1894_v47, %v1811_v48  ;;  %v2599_v50 = vpop.f32.mrb[1].mxu0 }
 0x5d7   : > { %v1897_v51 = vpop.f32.mrb[2].mxu0 }
 0x5d8   : > { %v1900_v0 = vmax.f32 %v1895_v49, 0.0  ;;  %v2600_v52 = vpop.f32.mrb[3].mxu0 }
 0x5da   : > { %v1901_v54 = vpack.c.bf16 %v1900_v0, %v1900_v0 }
 0x5dc   : > { %2618 = vmatmul.mubr.bf16.vlgmr.msra.gmra.mrb[0].mxu1 %v1901_v54 }
 0x6af   : > { %v2001_v4 = vpop.f32.mrb[0].mxu1 }
 0x6b0   : > { %v2002_v38 = vadd.f32 %v2001_v4, %v1918_v3  ;;  %v2619_v7 = vpop.f32.mrb[1].mxu1 }
 0x6b1   : > { %v2004_v8 = vpop.f32.mrb[2].mxu1 }
 0x6b2   : > { %v2007_v9 = vmax.f32 %v2002_v38, 0.0  ;;  %v2620_v11 = vpop.f32.mrb[3].mxu1 }
 0x6b4   : > { %v2008_v13 = vpack.c.bf16 %v2007_v9, %v2007_v9 }
 0x6b6   : > { %2638 = vmatmul.mubr.bf16.vlgmr.msra.gmra.mrb[4].mxu0 %v2008_v13 }
 0x789   : > { %v2108_v16 = vpop.f32.mrb[4].mxu0 }
 0x78a   : > { %v2109_v17 = vadd.f32 %v2108_v16, %v2025_v15  ;;  %v2639_v63 = vpop.f32.mrb[5].mxu0 }
 0x78b   : > { %v2111_v55 = vpop.f32.mrb[6].mxu0 }
 0x78c   : > { %2114 = vst [vmem:[#allocation28] sm:$0x1] %v2109_v17  ;;  %v2640_v18 = vpop.f32.mrb[7].mxu0 }
 0x78d PF: > { %s4466_s18 = sld [smem:[#allocation40_spill]]  ;;  %s3436_s17 = smov [#allocation28]  }
 0x78e   : > { %s2122_s30 = sshll.u32 %s3436_s17, 4  ;;  %s2123_s30 = int_to_ptr.vmem [resolvable:$true] %s2122_s30 }
 0x78f   : > { %s3317_s2 = scalar_lea.vmem %s2123_s30, 16  ;;  %s3323_s27 = scalar_lea.vmem %s2123_s30, 32 }
 0x790   : > { %p3318_p8 = scmp.ne.s32.totalorder %s2123_s30, %s3317_s2  ;;  %p3324_p10 = scmp.lt.s32.totalorder %s2123_s30, %s2123_s30 }
 0x791   : > { %p3325_p7 = scmp.lt.s32.totalorder %s3323_s27, %s3317_s2 }
 0x793   : > { %p2742_p0 = scmp.eq.s32.totalorder %s4466_s18, 1  ;;  %p3326_p11 = por %p3325_p7, %p3324_p10 }
 0x795   : > { %p3319_p3 = pnand %p3318_p8, %p2742_p0 }
 0x797   : > { %p3320_p13 = pneg %p3319_p3 }
 0x799   : > { %p3327_p1 = pnand %p3326_p11, %p3320_p13 }
 0x79b   : > { %3330 = shalt.err (!%p3327_p1)
}
 0x79c   : > { %s4467_s21 = sld [smem:[#allocation57_spill]] }
 0x7a2   : > { %s4468_s28 = smov %s4467_s21  ;;  %s3331_s20 = scalar_lea.hbm %s4467_s21, 16 }
 0x7a3   : > { %p3332_p2 = scmp.ne.s32.totalorder %s4468_s28, %s3331_s20  ;;  %p3337_p6 = scmp.lt.u32.totalorder %s3331_s20, %s4468_s28 }
 0x7a5   : > { %p3333_p12 = pnand %p3332_p2, %p2742_p0 }
 0x7a7   : > { %p3334_p4 = pneg %p3333_p12 }
 0x7a9   : > { %p3339_p5 = pnand %p3337_p6, %p3334_p4 }
 0x7ab   : > { %3342 = shalt.err (!%p3339_p5)
}
 0x7ac   : > { %2682 = dma.vmem_to_hbm [thread:$0]  (%p2742_p0), %s2123_s30, 16, %s4468_s28, [#allocation7]  }
 0x7ad   : > { %3392 = dma.done.wait (%p2742_p0), [#allocation7], 16  }
 0x7ae   : > { %3394 = vsyncadd (%p2742_p0), [#allocation7], 4294967280 }
 0x7af PF: > { %s4469_s21 = sld [smem:[#allocation43_spill]]  ;;  %s4470_s0 = sld [smem:[#allocation38_spill]] }
 0x7b0   : > { %s4471_s30 = sld [smem:[#allocation39_spill]]  ;;  %s4472_s20 = sld [smem:[#allocation44_spill]] }
 0x7b5   : > { %p43_p9 = scmp.ge.s32.totalorder %s4469_s21, 4  }
 0x7b7   :  { %45 = sbr.rel (!%p43_p9) target bundleno = 28 (0x1c), region = 249 }
 0x7be   :  { %2135 = vsyncpa [#allocation6], 1 }
 0x7bf   :  { %2137 = vsyncpa [#allocation6 + $0x1], 1 }
 0x7c0   :  { %2138 = vsyncpa [#allocation9], 1 }
 0x7c1   :  { %2139 = vsyncpa [#allocation12], 1 }
 0x7c2   :  { %2141 = vsyncpa [#allocation12 + $0x1], 1 }
 0x7c3   :  { %2142 = vsyncpa [#allocation15], 1 }
 0x7c4   :  { %2144 = vsyncpa [#allocation15 + $0x1], 1 }
 0x7c5   :  { %2145 = vsyncpa [#allocation18], 1 }
 0x7c6   :  { %2147 = vsyncpa [#allocation18 + $0x1], 1 }
 0x7c7   :  { %2148 = vsyncpa [#allocation21], 1 }
 0x7c8   :  { %2150 = vsyncpa [#allocation21 + $0x1], 1 }
 0x7c9   :  { %2151 = vsyncpa [#allocation24], 1 }
 0x7ca   :  { %2152 = vsyncpa [#allocation27], 1 }
 0x7cb   :  { %2153 = vsyncpa [#allocation7], 1 }
 0x7cc   :  { %2155 = vsyncpa [#allocation7 + $0x1], 1 }

</bundles_post_ra>
